<compile_context>
chip_gen: v5e
topology: v5e:2x2
jax: 0.10.0
libtpu: 0.0.40
codegen_flags: <defaults>
</compile_context>

<pallas_src>
import math
import functools

import jax
import jax.numpy as jnp
from jax.experimental import pallas as pl
from jax.experimental.pallas import tpu as pltpu


def _layernorm(x, gamma, beta, eps=1e-5):
    mu = jnp.mean(x, axis=-1, keepdims=True)
    var = jnp.mean((x - mu) ** 2, axis=-1, keepdims=True)
    return (x - mu) * jax.lax.rsqrt(var + eps) * gamma + beta


# ---------------------------------------------------------------------------
# Pass 1: LN1 + QKV projection (once per token tile), head-major outputs.
# ---------------------------------------------------------------------------
def qkv_kernel(x_ref, g_ref, b_ref, wqkv_ref, q_ref, k_ref, v_ref, *,
               n_heads: int, t: int, scale: float):
    C = x_ref.shape[2]
    H = n_heads
    hd = C // H
    mxu_dt = wqkv_ref.dtype

    xf = x_ref[0].astype(jnp.float32)                               # (t, C)
    h = _layernorm(xf, g_ref[...], b_ref[...])
    qkv = jnp.dot(h.astype(mxu_dt), wqkv_ref[...],
                  preferred_element_type=jnp.float32)               # (t, 3C)

    def to_heads(m):                                                # (t, C) -> (H, t, hd)
        return jnp.transpose(m.reshape(t, H, hd), (1, 0, 2))

    # Fold the 1/sqrt(hd) softmax scale into Q (cheaper than scaling scores).
    q_ref[0] = to_heads(qkv[:, 0:C] * scale).astype(q_ref.dtype)
    k_ref[0] = to_heads(qkv[:, C:2 * C]).astype(k_ref.dtype)
    v_ref[0] = to_heads(qkv[:, 2 * C:3 * C]).astype(v_ref.dtype)


# ---------------------------------------------------------------------------
# Pass 2: causal flash attention over KV tiles + proj + residual + LN2 + MLP.
# ---------------------------------------------------------------------------
def attn_mlp_kernel(x_ref, q_ref, k_ref, v_ref,
                    wproj_ref, ln2g_ref, ln2b_ref,
                    w1_ref, b1_ref, w2_ref, b2_ref,
                    o_ref,
                    m_ref, l_ref, acc_ref, *,
                    t: int, approx_recip: bool):
    H = q_ref.shape[1]
    hd = q_ref.shape[3]
    mxu_dt = wproj_ref.dtype
    qi = pl.program_id(1)
    ki = pl.program_id(2)

    @pl.when(ki == 0)
    def _init():
        m_ref[...] = jnp.full_like(m_ref, -1e30)
        l_ref[...] = jnp.zeros_like(l_ref)
        acc_ref[...] = jnp.zeros_like(acc_ref)

    def scores():                                                   # (H, t, t)
        return jnp.einsum('hqd,hkd->hqk', q_ref[0], k_ref[0],
                          preferred_element_type=jnp.float32)

    def flash_update(s):
        m_prev = m_ref[...]                                         # (H, t, 1)
        m_new = jnp.maximum(m_prev, jnp.max(s, axis=-1, keepdims=True))
        alpha = jnp.exp(m_prev - m_new)
        p = jnp.exp(s - m_new)
        l_ref[...] = alpha * l_ref[...] + jnp.sum(p, axis=-1, keepdims=True)
        pv = jnp.einsum('hqk,hkd->hqd', p.astype(mxu_dt), v_ref[0],
                        preferred_element_type=jnp.float32)         # (H, t, hd)
        acc_ref[...] = alpha * acc_ref[...] + pv
        m_ref[...] = m_new

    # Off-diagonal causal tiles: fully unmasked -> no compare / select.
    @pl.when(ki < qi)
    def _off_diag():
        flash_update(scores())

    # Diagonal tile: the only tile that needs the causal mask (t_kv == t_q, so
    # every visited row has >= 1 unmasked entry and the -1e30 scheme is safe).
    @pl.when(ki == qi)
    def _diag():
        iq = jax.lax.broadcasted_iota(jnp.int32, (t, t), 0)
        ik = jax.lax.broadcasted_iota(jnp.int32, (t, t), 1)
        s = jnp.where((iq >= ik)[None], scores(), -1e30)
        flash_update(s)

    # ki > qi: fully-masked future tile -> no compute; the K/V index_map also
    # pins these steps to the diagonal block so no extra DMA is issued.

    @pl.when(ki == pl.num_programs(2) - 1)
    def _finalize():
        y = acc_ref[...] * pl.reciprocal(l_ref[...], approx=approx_recip)
        y = jnp.transpose(y, (1, 0, 2)).reshape(t, H * hd)          # merge heads
        y = jnp.dot(y.astype(mxu_dt), wproj_ref[...],
                    preferred_element_type=jnp.float32)             # (t, C)
        x1 = x_ref[0].astype(jnp.float32) + y                       # residual 1

        h2 = _layernorm(x1, ln2g_ref[...], ln2b_ref[...])
        f = jnp.dot(h2.astype(mxu_dt), w1_ref[...],
                    preferred_element_type=jnp.float32) + b1_ref[...]
        f = 0.5 * f * (1.0 + jax.lax.erf(f * (1.0 / math.sqrt(2.0))))  # exact GELU
        f = jnp.dot(f.astype(mxu_dt), w2_ref[...],
                    preferred_element_type=jnp.float32) + b2_ref[...]
        o_ref[0] = (x1 + f).astype(o_ref.dtype)                     # residual 2


# ---------------------------------------------------------------------------
# Host-side wrapper.
# ---------------------------------------------------------------------------
def _pick_tile(T, cap):
    """Largest divisor of T that is <= cap and a multiple of 8 (else T)."""
    if T <= cap:
        return T
    for cand in range(min(cap, T), 0, -1):
        if T % cand == 0 and cand % 8 == 0:
            return cand
    return T


def _vmem_limit(est_bytes):
    cap = 64 * 1024 * 1024
    try:
        cap = int(getattr(pltpu.get_tpu_info(), "vmem_capacity_bytes", cap))
    except Exception:
        pass
    # ~108 MiB cap on 128 MiB parts (v5e/v6e), ~54 MiB on v7x.
    return int(min(max(est_bytes * 1.5, 32 * 1024 * 1024), cap * 0.85))


def _transformer_block(x, params, n_heads, *, mxu_dtype, q_block,
                       approx_softmax_recip, single_buffer_consts):
    B, T, C = x.shape
    (ln1g, ln1b, wqkv, wproj, ln2g, ln2b, w1, b1, w2, b2) = params
    H = n_heads
    hd = C // H
    assert hd * H == C, "emb_dim must be divisible by n_heads"

    t = _pick_tile(T, q_block)
    assert T % t == 0
    n_t = T // t
    scale = 1.0 / math.sqrt(hd)
    wb = jnp.dtype(mxu_dtype).itemsize

    # Big matmul weights pre-cast to the MXU dtype (constant index_map ->
    # fetched once; bf16 halves HBM/VMEM footprint). LN params / biases stay
    # f32 (added after the f32-accumulated matmuls).
    wqkv, wproj, w1, w2 = (w.astype(mxu_dtype) for w in (wqkv, wproj, w1, w2))

    if single_buffer_consts:
        def const(a):
            return pl.BlockSpec(a.shape, lambda *_: (0,) * a.ndim,
                                pipeline_mode=pl.Buffered(1))
        cmult = 1
    else:
        def const(a):
            return pl.BlockSpec(a.shape, lambda *_: (0,) * a.ndim)
        cmult = 2

    # ---- pass 1: LN1 + QKV projection -> head-major Q/K/V in MXU dtype ----
    qkv_est = (3 * C * C * wb * cmult + 2 * C * 4 * cmult
               + 2 * t * C * 4 + 3 * 2 * t * C * wb
               + 4 * (2 * t * C + 2 * 3 * t * C))
    q, k, v = pl.pallas_call(
        functools.partial(qkv_kernel, n_heads=H, t=t, scale=scale),
        out_shape=[jax.ShapeDtypeStruct((B, H, T, hd), mxu_dtype)
                   for _ in range(3)],
        grid_spec=pltpu.PrefetchScalarGridSpec(
            num_scalar_prefetch=0,
            grid=(B, n_t),
            in_specs=[
                pl.BlockSpec((1, t, C), lambda b, i: (b, i, 0)),
                const(ln1g), const(ln1b), const(wqkv),
            ],
            out_specs=[pl.BlockSpec((1, H, t, hd), lambda b, i: (b, 0, i, 0))
                       for _ in range(3)],
        ),
        compiler_params=pltpu.CompilerParams(
            dimension_semantics=("parallel", "parallel"),
            vmem_limit_bytes=_vmem_limit(qkv_est),
        ),
    )(x, ln1g, ln1b, wqkv)

    # ---- pass 2: flash attention over causal KV tiles + proj + MLP ----
    attn_est = ((C * C + 8 * C * C) * wb * cmult + 7 * C * 4 * cmult
                + 2 * t * C * 4 + 2 * t * C * wb + 2 * 2 * t * C * wb
                + 2 * t * C * 4
                + (2 * H * t * 128 + H * t * hd) * 4
                + 4 * (3 * H * t * t + 2 * H * t * hd + 4 * t * C + 8 * t * C))
    kv_idx = lambda b, qi, ki: (b, 0, jnp.minimum(ki, qi), 0)
    return pl.pallas_call(
        functools.partial(attn_mlp_kernel, t=t,
                          approx_recip=approx_softmax_recip),
        out_shape=jax.ShapeDtypeStruct((B, T, C), x.dtype),
        grid_spec=pltpu.PrefetchScalarGridSpec(
            num_scalar_prefetch=0,
            grid=(B, n_t, n_t),
            in_specs=[
                pl.BlockSpec((1, t, C), lambda b, qi, ki: (b, qi, 0)),        # x (residual)
                pl.BlockSpec((1, H, t, hd), lambda b, qi, ki: (b, 0, qi, 0)),  # Q tile
                pl.BlockSpec((1, H, t, hd), kv_idx),                          # K tile
                pl.BlockSpec((1, H, t, hd), kv_idx),                          # V tile
                const(wproj), const(ln2g), const(ln2b),
                const(w1), const(b1), const(w2), const(b2),
            ],
            out_specs=pl.BlockSpec((1, t, C), lambda b, qi, ki: (b, qi, 0)),
            scratch_shapes=[
                pltpu.VMEM((H, t, 1), jnp.float32),    # running max
                pltpu.VMEM((H, t, 1), jnp.float32),    # running denominator
                pltpu.VMEM((H, t, hd), jnp.float32),   # output accumulator
            ],
        ),
        compiler_params=pltpu.CompilerParams(
            dimension_semantics=("parallel", "parallel", "arbitrary"),
            vmem_limit_bytes=_vmem_limit(attn_est),
        ),
    )(x, q, k, v, wproj, ln2g, ln2b, w1, b1, w2, b2)


def transformer_block(x, params, n_heads, *, mxu_dtype=jnp.bfloat16,
                      q_block=256, approx_softmax_recip=False):
    """Fused transformer block (eval-mode semantics).

    q_block: sweep per generation — ~512 on v6e (128 MiB VMEM), 128-256 on
             v5e (128-aligned MXU) and v7x (64 MiB VMEM).
    """
    try:
        return _transformer_block(x, params, n_heads, mxu_dtype=mxu_dtype,
                                  q_block=q_block,
                                  approx_softmax_recip=approx_softmax_recip,
                                  single_buffer_consts=True)
    except Exception:
        # pipeline_mode=pl.Buffered(1) not supported on this JAX version:
        # fall back to default (double-buffered) constant operands.
        return _transformer_block(x, params, n_heads, mxu_dtype=mxu_dtype,
                                  q_block=q_block,
                                  approx_softmax_recip=approx_softmax_recip,
                                  single_buffer_consts=False)


# ---------------------------------------------------------------------------
# Pure-JAX reference (matches the PyTorch module in eval mode).
# ---------------------------------------------------------------------------
def transformer_block_ref(x, params, n_heads):
    (ln1g, ln1b, wqkv, wproj, ln2g, ln2b, w1, b1, w2, b2) = params
    B, T, C = x.shape
    hd = C // n_heads
    xf = x.astype(jnp.float32)

    h = _layernorm(xf, ln1g, ln1b)
    qkv = h @ wqkv
    q, k, v = jnp.split(qkv, 3, axis=-1)
    reshape_heads = lambda m: m.reshape(B, T, n_heads, hd).transpose(0, 2, 1, 3)
    q, k, v = map(reshape_heads, (q, k, v))
    att = jnp.einsum("bhtd,bhsd->bhts", q, k) / math.sqrt(hd)
    causal = jnp.tril(jnp.ones((T, T), dtype=bool))
    att = jnp.where(causal[None, None], att, -jnp.inf)
    att = jax.nn.softmax(att, axis=-1)
    y = jnp.einsum("bhts,bhsd->bhtd", att, v)
    y = y.transpose(0, 2, 1, 3).reshape(B, T, C) @ wproj
    xf = xf + y

    h2 = _layernorm(xf, ln2g, ln2b)
    f = h2 @ w1 + b1
    f = 0.5 * f * (1.0 + jax.lax.erf(f / math.sqrt(2.0)))
    f = f @ w2 + b2
    return (xf + f).astype(x.dtype)


if __name__ == "__main__":
    # small config consistent with the module: emb_dim=32, n_heads=4
    C, H = 32, 4
    key = jax.random.PRNGKey(0)
    ks = jax.random.split(key, 8)
    s = 0.02
    ln1g = jnp.ones((1, C), jnp.float32)
    ln1b = jnp.zeros((1, C), jnp.float32)
    ln2g = jnp.ones((1, C), jnp.float32)
    ln2b = jnp.zeros((1, C), jnp.float32)
    wqkv = s * jax.random.normal(ks[0], (C, 3 * C), jnp.float32)
    wproj = s * jax.random.normal(ks[1], (C, C), jnp.float32)
    w1 = s * jax.random.normal(ks[2], (C, 4 * C), jnp.float32)
    b1 = s * jax.random.normal(ks[3], (1, 4 * C), jnp.float32)
    w2 = s * jax.random.normal(ks[4], (4 * C, C), jnp.float32)
    b2 = s * jax.random.normal(ks[5], (1, C), jnp.float32)
    params = (ln1g, ln1b, wqkv, wproj, ln2g, ln2b, w1, b1, w2, b2)

    # (1) exact-semantics check: f32 MXU operands, single query tile.
    B, T = 2, 8
    x = jax.random.normal(ks[6], (B, T, C), jnp.float32)
    ref = transformer_block_ref(x, params, H)
    out = jax.block_until_ready(transformer_block(x, params, H, mxu_dtype=jnp.float32))
    assert out.shape == (B, T, C)
    assert jnp.allclose(out, ref, atol=1e-4, rtol=1e-4), "f32 mismatch vs reference"

    # (2) perf path: bf16 MXU operands, f32 accumulation, approx softmax recip.
    out_bf = jax.block_until_ready(
        transformer_block(x, params, H, mxu_dtype=jnp.bfloat16,
                          approx_softmax_recip=True))
    assert jnp.allclose(out_bf, ref, atol=2e-2, rtol=2e-2), "bf16 mismatch vs reference"

    # (3) multi-tile flash path: 2 query tiles x 2 KV tiles (causal skipping,
    #     diagonal-only mask, off-diagonal unmasked path all exercised).
    T2 = 16
    x2 = jax.random.normal(ks[7], (B, T2, C), jnp.float32)
    ref2 = transformer_block_ref(x2, params, H)
    out2 = jax.block_until_ready(
        transformer_block(x2, params, H, mxu_dtype=jnp.float32, q_block=8))
    assert jnp.allclose(out2, ref2, atol=1e-4, rtol=1e-4), "tiled mismatch vs reference"

    print("KERNEL_OK")
</pallas_src>

<mosaic_0001>
module attributes {stable_mosaic.version = 11 : i64} {
  func.func @qkv_kernel(%arg0: i32, %arg1: i32, %arg2: memref<1x8x32xf32, #tpu.memory_space<vmem>>, %arg3: memref<1x32xf32, #tpu.memory_space<vmem>>, %arg4: memref<1x32xf32, #tpu.memory_space<vmem>>, %arg5: memref<32x96xf32, #tpu.memory_space<vmem>>, %arg6: memref<1x4x8x8xf32, #tpu.memory_space<vmem>>, %arg7: memref<1x4x8x8xf32, #tpu.memory_space<vmem>>, %arg8: memref<1x4x8x8xf32, #tpu.memory_space<vmem>>) attributes {dimension_semantics = [#tpu.dimension_semantics<parallel>, #tpu.dimension_semantics<parallel>], iteration_bounds = array<i64: 2, 1>, scalar_prefetch = 0 : i64, scratch_operands = 0 : i64, tpu.core_type = #tpu.core_type<tc>, window_params = [{transform_indices = @transform_0, window_bounds = array<i64: 1, 8, 32>}, {pipeline_mode = #tpu.pipeline_mode<synchronous>, transform_indices = @transform_1, window_bounds = array<i64: 1, 32>}, {pipeline_mode = #tpu.pipeline_mode<synchronous>, transform_indices = @transform_2, window_bounds = array<i64: 1, 32>}, {pipeline_mode = #tpu.pipeline_mode<synchronous>, transform_indices = @transform_3, window_bounds = array<i64: 32, 96>}, {transform_indices = @transform_4, window_bounds = array<i64: 1, 4, 8, 8>}, {transform_indices = @transform_5, window_bounds = array<i64: 1, 4, 8, 8>}, {transform_indices = @transform_6, window_bounds = array<i64: 1, 4, 8, 8>}]} {
    %c0 = arith.constant 0 : index
    %c0_0 = arith.constant 0 : index
    %c0_1 = arith.constant 0 : index
    %0 = vector.load %arg2[%c0, %c0_0, %c0_1] : memref<1x8x32xf32, #tpu.memory_space<vmem>>, vector<1x8x32xf32>
    %1 = vector.shape_cast %0 : vector<1x8x32xf32> to vector<8x32xf32>
    %c0_2 = arith.constant 0 : index
    %c0_3 = arith.constant 0 : index
    %2 = vector.load %arg3[%c0_2, %c0_3] : memref<1x32xf32, #tpu.memory_space<vmem>>, vector<1x32xf32>
    %c0_4 = arith.constant 0 : index
    %c0_5 = arith.constant 0 : index
    %3 = vector.load %arg4[%c0_4, %c0_5] : memref<1x32xf32, #tpu.memory_space<vmem>>, vector<1x32xf32>
    %cst = arith.constant dense<0.000000e+00> : vector<8xf32>
    %4 = vector.multi_reduction <add>, %1, %cst [1] : vector<8x32xf32> to vector<8xf32>
    %5 = vector.shape_cast %4 : vector<8xf32> to vector<8x1xf32>
    %cst_6 = arith.constant 3.200000e+01 : f32
    %6 = vector.broadcast %cst_6 : f32 to vector<8x1xf32>
    %7 = arith.divf %5, %6 : vector<8x1xf32>
    %8 = vector.broadcast %7 : vector<8x1xf32> to vector<8x32xf32>
    %9 = arith.subf %1, %8 : vector<8x32xf32>
    %10 = arith.mulf %9, %9 : vector<8x32xf32>
    %cst_7 = arith.constant dense<0.000000e+00> : vector<8xf32>
    %11 = vector.multi_reduction <add>, %10, %cst_7 [1] : vector<8x32xf32> to vector<8xf32>
    %12 = vector.shape_cast %11 : vector<8xf32> to vector<8x1xf32>
    %cst_8 = arith.constant 3.200000e+01 : f32
    %13 = vector.broadcast %cst_8 : f32 to vector<8x1xf32>
    %14 = arith.divf %12, %13 : vector<8x1xf32>
    %15 = vector.broadcast %7 : vector<8x1xf32> to vector<8x32xf32>
    %16 = arith.subf %1, %15 : vector<8x32xf32>
    %cst_9 = arith.constant 9.99999974E-6 : f32
    %17 = vector.broadcast %cst_9 : f32 to vector<8x1xf32>
    %18 = arith.addf %14, %17 : vector<8x1xf32>
    %19 = math.rsqrt %18 : vector<8x1xf32>
    %20 = vector.broadcast %19 : vector<8x1xf32> to vector<8x32xf32>
    %21 = arith.mulf %16, %20 : vector<8x32xf32>
    %22 = vector.broadcast %2 : vector<1x32xf32> to vector<8x32xf32>
    %23 = arith.mulf %21, %22 : vector<8x32xf32>
    %24 = vector.broadcast %3 : vector<1x32xf32> to vector<8x32xf32>
    %25 = arith.addf %23, %24 : vector<8x32xf32>
    %c0_10 = arith.constant 0 : index
    %c0_11 = arith.constant 0 : index
    %26 = vector.load %arg5[%c0_10, %c0_11] : memref<32x96xf32, #tpu.memory_space<vmem>>, vector<32x96xf32>
    %cst_12 = arith.constant dense<0.000000e+00> : vector<8x96xf32>
    %27 = tpu.matmul %25, %26, %cst_12 {dimension_numbers = #tpu.dot_dimension_numbers<[1], [0], [0], [1], [0, 0, 1, 1], [], []>} : vector<8x32xf32>, vector<32x96xf32>, vector<8x96xf32> -> vector<8x96xf32>
    %28 = vector.extract_strided_slice %27 {offsets = [0, 0], sizes = [8, 32], strides = [1, 1]} : vector<8x96xf32> to vector<8x32xf32>
    %cst_13 = arith.constant 0.353553385 : f32
    %29 = vector.broadcast %cst_13 : f32 to vector<8x32xf32>
    %30 = arith.mulf %28, %29 : vector<8x32xf32>
    %31 = vector.shape_cast %30 : vector<8x32xf32> to vector<8x4x8xf32>
    %32 = tpu.transpose %31, [1, 0, 2] : vector<8x4x8xf32> -> vector<4x8x8xf32>
    %c0_14 = arith.constant 0 : index
    %c0_15 = arith.constant 0 : index
    %c0_16 = arith.constant 0 : index
    %c0_17 = arith.constant 0 : index
    %33 = vector.load %arg6[%c0_14, %c0_15, %c0_16, %c0_17] : memref<1x4x8x8xf32, #tpu.memory_space<vmem>>, vector<1x4x8x8xf32>
    %34 = vector.shape_cast %33 : vector<1x4x8x8xf32> to vector<4x8x8xf32>
    %35 = vector.shape_cast %32 : vector<4x8x8xf32> to vector<1x4x8x8xf32>
    tpu.vector_store %arg6[%c0_14, %c0_15, %c0_16, %c0_17], %35 {strides = array<i32>} : memref<1x4x8x8xf32, #tpu.memory_space<vmem>>, vector<1x4x8x8xf32>,
    %36 = vector.extract_strided_slice %27 {offsets = [0, 32], sizes = [8, 32], strides = [1, 1]} : vector<8x96xf32> to vector<8x32xf32>
    %37 = vector.shape_cast %36 : vector<8x32xf32> to vector<8x4x8xf32>
    %38 = tpu.transpose %37, [1, 0, 2] : vector<8x4x8xf32> -> vector<4x8x8xf32>
    %c0_18 = arith.constant 0 : index
    %c0_19 = arith.constant 0 : index
    %c0_20 = arith.constant 0 : index
    %c0_21 = arith.constant 0 : index
    %39 = vector.load %arg7[%c0_18, %c0_19, %c0_20, %c0_21] : memref<1x4x8x8xf32, #tpu.memory_space<vmem>>, vector<1x4x8x8xf32>
    %40 = vector.shape_cast %39 : vector<1x4x8x8xf32> to vector<4x8x8xf32>
    %41 = vector.shape_cast %38 : vector<4x8x8xf32> to vector<1x4x8x8xf32>
    tpu.vector_store %arg7[%c0_18, %c0_19, %c0_20, %c0_21], %41 {strides = array<i32>} : memref<1x4x8x8xf32, #tpu.memory_space<vmem>>, vector<1x4x8x8xf32>,
    %42 = vector.extract_strided_slice %27 {offsets = [0, 64], sizes = [8, 32], strides = [1, 1]} : vector<8x96xf32> to vector<8x32xf32>
    %43 = vector.shape_cast %42 : vector<8x32xf32> to vector<8x4x8xf32>
    %44 = tpu.transpose %43, [1, 0, 2] : vector<8x4x8xf32> -> vector<4x8x8xf32>
    %c0_22 = arith.constant 0 : index
    %c0_23 = arith.constant 0 : index
    %c0_24 = arith.constant 0 : index
    %c0_25 = arith.constant 0 : index
    %45 = vector.load %arg8[%c0_22, %c0_23, %c0_24, %c0_25] : memref<1x4x8x8xf32, #tpu.memory_space<vmem>>, vector<1x4x8x8xf32>
    %46 = vector.shape_cast %45 : vector<1x4x8x8xf32> to vector<4x8x8xf32>
    %47 = vector.shape_cast %44 : vector<4x8x8xf32> to vector<1x4x8x8xf32>
    tpu.vector_store %arg8[%c0_22, %c0_23, %c0_24, %c0_25], %47 {strides = array<i32>} : memref<1x4x8x8xf32, #tpu.memory_space<vmem>>, vector<1x4x8x8xf32>,
    return
  }
  func.func @transform_0(%arg0: i32, %arg1: i32) -> (i32, i32, i32) {
    %c0_i32 = arith.constant 0 : i32
    %c0_i32_0 = arith.constant 0 : i32
    return %arg0, %arg1, %c0_i32 : i32, i32, i32
  }
  func.func @transform_1(%arg0: i32, %arg1: i32) -> (i32, i32) {
    %c0_i32 = arith.constant 0 : i32
    %c0_i32_0 = arith.constant 0 : i32
    %c0_i32_1 = arith.constant 0 : i32
    return %c0_i32, %c0_i32_0 : i32, i32
  }
  func.func @transform_2(%arg0: i32, %arg1: i32) -> (i32, i32) {
    %c0_i32 = arith.constant 0 : i32
    %c0_i32_0 = arith.constant 0 : i32
    %c0_i32_1 = arith.constant 0 : i32
    return %c0_i32, %c0_i32_0 : i32, i32
  }
  func.func @transform_3(%arg0: i32, %arg1: i32) -> (i32, i32) {
    %c0_i32 = arith.constant 0 : i32
    %c0_i32_0 = arith.constant 0 : i32
    %c0_i32_1 = arith.constant 0 : i32
    return %c0_i32, %c0_i32_0 : i32, i32
  }
  func.func @transform_4(%arg0: i32, %arg1: i32) -> (i32, i32, i32, i32) {
    %c0_i32 = arith.constant 0 : i32
    %c0_i32_0 = arith.constant 0 : i32
    %c0_i32_1 = arith.constant 0 : i32
    return %arg0, %c0_i32, %arg1, %c0_i32_0 : i32, i32, i32, i32
  }
  func.func @transform_5(%arg0: i32, %arg1: i32) -> (i32, i32, i32, i32) {
    %c0_i32 = arith.constant 0 : i32
    %c0_i32_0 = arith.constant 0 : i32
    %c0_i32_1 = arith.constant 0 : i32
    return %arg0, %c0_i32, %arg1, %c0_i32_0 : i32, i32, i32, i32
  }
  func.func @transform_6(%arg0: i32, %arg1: i32) -> (i32, i32, i32, i32) {
    %c0_i32 = arith.constant 0 : i32
    %c0_i32_0 = arith.constant 0 : i32
    %c0_i32_1 = arith.constant 0 : i32
    return %arg0, %c0_i32, %arg1, %c0_i32_0 : i32, i32, i32, i32
  }
}

module attributes {stable_mosaic.version = 11 : i64} {
  func.func @qkv_kernel(%arg0: i32, %arg1: i32, %arg2: memref<1x8x32xf32, #tpu.memory_space<vmem>>, %arg3: memref<1x32xf32, #tpu.memory_space<vmem>>, %arg4: memref<1x32xf32, #tpu.memory_space<vmem>>, %arg5: memref<32x96xf32, #tpu.memory_space<vmem>>, %arg6: memref<1x4x8x8xf32, #tpu.memory_space<vmem>>, %arg7: memref<1x4x8x8xf32, #tpu.memory_space<vmem>>, %arg8: memref<1x4x8x8xf32, #tpu.memory_space<vmem>>) attributes {dimension_semantics = [#tpu.dimension_semantics<parallel>, #tpu.dimension_semantics<parallel>], iteration_bounds = array<i64: 2, 1>, scalar_prefetch = 0 : i64, scratch_operands = 0 : i64, tpu.core_type = #tpu.core_type<tc>, window_params = [{transform_indices = @transform_0, window_bounds = array<i64: 1, 8, 32>}, {pipeline_mode = #tpu.pipeline_mode<synchronous>, transform_indices = @transform_1, window_bounds = array<i64: 1, 32>}, {pipeline_mode = #tpu.pipeline_mode<synchronous>, transform_indices = @transform_2, window_bounds = array<i64: 1, 32>}, {pipeline_mode = #tpu.pipeline_mode<synchronous>, transform_indices = @transform_3, window_bounds = array<i64: 32, 96>}, {transform_indices = @transform_4, window_bounds = array<i64: 1, 4, 8, 8>}, {transform_indices = @transform_5, window_bounds = array<i64: 1, 4, 8, 8>}, {transform_indices = @transform_6, window_bounds = array<i64: 1, 4, 8, 8>}]} {
    %c0 = arith.constant 0 : index
    %c0_0 = arith.constant 0 : index
    %c0_1 = arith.constant 0 : index
    %0 = vector.load %arg2[%c0, %c0_0, %c0_1] : memref<1x8x32xf32, #tpu.memory_space<vmem>>, vector<1x8x32xf32>
    %1 = vector.shape_cast %0 : vector<1x8x32xf32> to vector<8x32xf32>
    %c0_2 = arith.constant 0 : index
    %c0_3 = arith.constant 0 : index
    %2 = vector.load %arg3[%c0_2, %c0_3] : memref<1x32xf32, #tpu.memory_space<vmem>>, vector<1x32xf32>
    %c0_4 = arith.constant 0 : index
    %c0_5 = arith.constant 0 : index
    %3 = vector.load %arg4[%c0_4, %c0_5] : memref<1x32xf32, #tpu.memory_space<vmem>>, vector<1x32xf32>
    %cst = arith.constant dense<0.000000e+00> : vector<8xf32>
    %4 = vector.multi_reduction <add>, %1, %cst [1] : vector<8x32xf32> to vector<8xf32>
    %5 = vector.shape_cast %4 : vector<8xf32> to vector<8x1xf32>
    %cst_6 = arith.constant 3.200000e+01 : f32
    %6 = vector.broadcast %cst_6 : f32 to vector<8x1xf32>
    %7 = arith.divf %5, %6 : vector<8x1xf32>
    %8 = vector.broadcast %7 : vector<8x1xf32> to vector<8x32xf32>
    %9 = arith.subf %1, %8 : vector<8x32xf32>
    %10 = arith.mulf %9, %9 : vector<8x32xf32>
    %cst_7 = arith.constant dense<0.000000e+00> : vector<8xf32>
    %11 = vector.multi_reduction <add>, %10, %cst_7 [1] : vector<8x32xf32> to vector<8xf32>
    %12 = vector.shape_cast %11 : vector<8xf32> to vector<8x1xf32>
    %cst_8 = arith.constant 3.200000e+01 : f32
    %13 = vector.broadcast %cst_8 : f32 to vector<8x1xf32>
    %14 = arith.divf %12, %13 : vector<8x1xf32>
    %15 = vector.broadcast %7 : vector<8x1xf32> to vector<8x32xf32>
    %16 = arith.subf %1, %15 : vector<8x32xf32>
    %cst_9 = arith.constant 9.99999974E-6 : f32
    %17 = vector.broadcast %cst_9 : f32 to vector<8x1xf32>
    %18 = arith.addf %14, %17 : vector<8x1xf32>
    %19 = math.rsqrt %18 : vector<8x1xf32>
    %20 = vector.broadcast %19 : vector<8x1xf32> to vector<8x32xf32>
    %21 = arith.mulf %16, %20 : vector<8x32xf32>
    %22 = vector.broadcast %2 : vector<1x32xf32> to vector<8x32xf32>
    %23 = arith.mulf %21, %22 : vector<8x32xf32>
    %24 = vector.broadcast %3 : vector<1x32xf32> to vector<8x32xf32>
    %25 = arith.addf %23, %24 : vector<8x32xf32>
    %c0_10 = arith.constant 0 : index
    %c0_11 = arith.constant 0 : index
    %26 = vector.load %arg5[%c0_10, %c0_11] : memref<32x96xf32, #tpu.memory_space<vmem>>, vector<32x96xf32>
    %cst_12 = arith.constant dense<0.000000e+00> : vector<8x96xf32>
    %27 = tpu.matmul %25, %26, %cst_12 {dimension_numbers = #tpu.dot_dimension_numbers<[1], [0], [0], [1], [0, 0, 1, 1], [], []>} : vector<8x32xf32>, vector<32x96xf32>, vector<8x96xf32> -> vector<8x96xf32>
    %28 = vector.extract_strided_slice %27 {offsets = [0, 0], sizes = [8, 32], strides = [1, 1]} : vector<8x96xf32> to vector<8x32xf32>
    %cst_13 = arith.constant 0.353553385 : f32
    %29 = vector.broadcast %cst_13 : f32 to vector<8x32xf32>
    %30 = arith.mulf %28, %29 : vector<8x32xf32>
    %31 = vector.shape_cast %30 : vector<8x32xf32> to vector<8x4x8xf32>
    %32 = tpu.transpose %31, [1, 0, 2] : vector<8x4x8xf32> -> vector<4x8x8xf32>
    %c0_14 = arith.constant 0 : index
    %c0_15 = arith.constant 0 : index
    %c0_16 = arith.constant 0 : index
    %c0_17 = arith.constant 0 : index
    %33 = vector.load %arg6[%c0_14, %c0_15, %c0_16, %c0_17] : memref<1x4x8x8xf32, #tpu.memory_space<vmem>>, vector<1x4x8x8xf32>
    %34 = vector.shape_cast %33 : vector<1x4x8x8xf32> to vector<4x8x8xf32>
    %35 = vector.shape_cast %32 : vector<4x8x8xf32> to vector<1x4x8x8xf32>
    tpu.vector_store %arg6[%c0_14, %c0_15, %c0_16, %c0_17], %35 {strides = array<i32>} : memref<1x4x8x8xf32, #tpu.memory_space<vmem>>, vector<1x4x8x8xf32>,
    %36 = vector.extract_strided_slice %27 {offsets = [0, 32], sizes = [8, 32], strides = [1, 1]} : vector<8x96xf32> to vector<8x32xf32>
    %37 = vector.shape_cast %36 : vector<8x32xf32> to vector<8x4x8xf32>
    %38 = tpu.transpose %37, [1, 0, 2] : vector<8x4x8xf32> -> vector<4x8x8xf32>
    %c0_18 = arith.constant 0 : index
    %c0_19 = arith.constant 0 : index
    %c0_20 = arith.constant 0 : index
    %c0_21 = arith.constant 0 : index
    %39 = vector.load %arg7[%c0_18, %c0_19, %c0_20, %c0_21] : memref<1x4x8x8xf32, #tpu.memory_space<vmem>>, vector<1x4x8x8xf32>
    %40 = vector.shape_cast %39 : vector<1x4x8x8xf32> to vector<4x8x8xf32>
    %41 = vector.shape_cast %38 : vector<4x8x8xf32> to vector<1x4x8x8xf32>
    tpu.vector_store %arg7[%c0_18, %c0_19, %c0_20, %c0_21], %41 {strides = array<i32>} : memref<1x4x8x8xf32, #tpu.memory_space<vmem>>, vector<1x4x8x8xf32>,
    %42 = vector.extract_strided_slice %27 {offsets = [0, 64], sizes = [8, 32], strides = [1, 1]} : vector<8x96xf32> to vector<8x32xf32>
    %43 = vector.shape_cast %42 : vector<8x32xf32> to vector<8x4x8xf32>
    %44 = tpu.transpose %43, [1, 0, 2] : vector<8x4x8xf32> -> vector<4x8x8xf32>
    %c0_22 = arith.constant 0 : index
    %c0_23 = arith.constant 0 : index
    %c0_24 = arith.constant 0 : index
    %c0_25 = arith.constant 0 : index
    %45 = vector.load %arg8[%c0_22, %c0_23, %c0_24, %c0_25] : memref<1x4x8x8xf32, #tpu.memory_space<vmem>>, vector<1x4x8x8xf32>
    %46 = vector.shape_cast %45 : vector<1x4x8x8xf32> to vector<4x8x8xf32>
    %47 = vector.shape_cast %44 : vector<4x8x8xf32> to vector<1x4x8x8xf32>
    tpu.vector_store %arg8[%c0_22, %c0_23, %c0_24, %c0_25], %47 {strides = array<i32>} : memref<1x4x8x8xf32, #tpu.memory_space<vmem>>, vector<1x4x8x8xf32>,
    return
  }
  func.func @transform_0(%arg0: i32, %arg1: i32) -> (i32, i32, i32) {
    %c0_i32 = arith.constant 0 : i32
    %c0_i32_0 = arith.constant 0 : i32
    return %arg0, %arg1, %c0_i32 : i32, i32, i32
  }
  func.func @transform_1(%arg0: i32, %arg1: i32) -> (i32, i32) {
    %c0_i32 = arith.constant 0 : i32
    %c0_i32_0 = arith.constant 0 : i32
    %c0_i32_1 = arith.constant 0 : i32
    return %c0_i32, %c0_i32_0 : i32, i32
  }
  func.func @transform_2(%arg0: i32, %arg1: i32) -> (i32, i32) {
    %c0_i32 = arith.constant 0 : i32
    %c0_i32_0 = arith.constant 0 : i32
    %c0_i32_1 = arith.constant 0 : i32
    return %c0_i32, %c0_i32_0 : i32, i32
  }
  func.func @transform_3(%arg0: i32, %arg1: i32) -> (i32, i32) {
    %c0_i32 = arith.constant 0 : i32
    %c0_i32_0 = arith.constant 0 : i32
    %c0_i32_1 = arith.constant 0 : i32
    return %c0_i32, %c0_i32_0 : i32, i32
  }
  func.func @transform_4(%arg0: i32, %arg1: i32) -> (i32, i32, i32, i32) {
    %c0_i32 = arith.constant 0 : i32
    %c0_i32_0 = arith.constant 0 : i32
    %c0_i32_1 = arith.constant 0 : i32
    return %arg0, %c0_i32, %arg1, %c0_i32_0 : i32, i32, i32, i32
  }
  func.func @transform_5(%arg0: i32, %arg1: i32) -> (i32, i32, i32, i32) {
    %c0_i32 = arith.constant 0 : i32
    %c0_i32_0 = arith.constant 0 : i32
    %c0_i32_1 = arith.constant 0 : i32
    return %arg0, %c0_i32, %arg1, %c0_i32_0 : i32, i32, i32, i32
  }
  func.func @transform_6(%arg0: i32, %arg1: i32) -> (i32, i32, i32, i32) {
    %c0_i32 = arith.constant 0 : i32
    %c0_i32_0 = arith.constant 0 : i32
    %c0_i32_1 = arith.constant 0 : i32
    return %arg0, %c0_i32, %arg1, %c0_i32_0 : i32, i32, i32, i32
  }
}

</mosaic_0001>

<bundles_post_ra>
// kernel: tpu_custom_call.1
= control target key start
LH: loop header
LB: loop body
LE: loop exit
PB: predicated region body
PF: predicated region fallthrough
CT: control target
= control target key end

     0   :  { %s1844_s0 = inlined_call_operand.hbm [shape: f32[2,8,32], index: 0, kind: input, shape index: {}]   ;;  %s1845_s1 = inlined_call_operand.hbm [shape: f32[1,32], index: 1, kind: input, shape index: {}]   ;;  %s1846_s2 = inlined_call_operand.vmem [shape: f32[1,32], index: 2, kind: input, shape index: {}]   ;;  %s1847_s3 = inlined_call_operand.hbm [shape: f32[32,96], index: 3, kind: input, shape index: {}]   ;;  %s1848_s4 = inlined_call_operand.hbm [shape: f32[2,4,8,8], index: 4, kind: output, shape index: {0}]   ;;  %s1849_s5 = inlined_call_operand.hbm [shape: f32[2,4,8,8], index: 5, kind: output, shape index: {1}]   ;;  %s1850_s6 = inlined_call_operand.hbm [shape: f32[2,4,8,8], index: 6, kind: output, shape index: {2}]  }
   0x1   :  { %1852 = sst [smem:[#allocation16_spill]] %s1845_s1 }
   0x2   :  { %12 = vsyncpa [#allocation3], 0 }
   0x3   :  { %14 = vsyncpa [#allocation3 + $0x1], 0 }
   0x4   :  { %15 = vsyncpa [#allocation6], 0 }
   0x5   :  { %16 = vsyncpa [#allocation4], 0 }
   0x6   :  { %18 = vsyncpa [#allocation4 + $0x1], 0 }
   0x7   :  { %19 = vsyncpa [#allocation10], 0 }
   0x8   :  { %21 = vsyncpa [#allocation10 + $0x1], 0  ;;  %s1454_s21 = smov 0   ;;  %s1456_s22 = smov 0  }
   0x9   :  { %s1458_s23 = smov 0   ;;  %s1460_s24 = smov 0  }
   0xa   :  { %s1462_s25 = smov 0   ;;  %s1464_s26 = smov 0  }
   0xb LB: > { %s1485_s27 = sadd.s32 4294967295, %s1403_s26   ;;  %s1851_s28 = sadd.s32 4294967294, %s1403_s26   ;;  %s1403_s26 = sphi %s1464_s26, %s27_s26   ;;  %s1399_s25 = sphi %s1462_s25, %s1863_s25   ;;  %s1395_s24 = sphi %s1460_s24, %s1862_s24   ;;  %s1391_s23 = sphi %s1458_s23, %s1861_s23   ;;  %s1387_s22 = sphi %s1456_s22, %s1860_s22   ;;  %s1383_s21 = sphi %s1454_s21, %s1859_s21  }
   0xc   : > { %p61_p0 = scmp.ne.s32.totalorder %s1387_s22, %s1383_s21  ;;  %p62_p1 = scmp.eq.s32.totalorder %s1485_s27, 0 }
   0xd   : > { %p156_p2 = scmp.eq.s32.totalorder %s1851_s28, 1  ;;  %p1028_p4 = scmp.ge.s32.totalorder %s1403_s26, 1 }
   0xe   : > { %p1495_p3 = por %p62_p1, %p61_p0  ;;  %p219_p6 = scmp.lt.s32.totalorder %s1403_s26, 3 }
   0xf   : > { %p1500_p5 = por %p156_p2, %p61_p0  ;;  %s1855_s1 = sld [smem:[#allocation16_spill]] }
  0x10   : > { %p1508_p7 = pnand %p1028_p4, %p219_p6  ;;  %p1031_p8 = scmp.ge.s32.totalorder %s1403_s26, 2 }
  0x11   : > { %s1405_s11 = smov [#allocation5]   ;;  %s245_s15 = sshll.u32 %s1847_s3, 4  ;;  %s246_s15 = int_to_ptr.hbm [resolvable:$true] %s245_s15 }
  0x12   : > { %p1072_p9 = pneg %p1508_p7  ;;  %s233_s12 = sshll.u32 %s1405_s11, 4  ;;  %s234_s12 = int_to_ptr.vmem [resolvable:$true] %s233_s12 }
  0x13   : > { %s1406_s16 = smov [#allocation7]   ;;  %s1407_s18 = smov 128  }
  0x14   : > { %p1073_p10 = pnand %p1072_p9, %p62_p1  ;;  %s247_s17 = sshll.u32 %s1406_s16, 4  ;;  %s248_s17 = int_to_ptr.vmem [resolvable:$true] %s247_s17 }
  0x15   : > { %s231_s9 = sshll.u32 %s1855_s1, 4  ;;  %s1408_s19 = smov 8   ;;  %s232_s9 = int_to_ptr.hbm [resolvable:$true] %s231_s9 }
  0x16   : > { %1075 = dma.hbm_to_vmem [thread:$0]  (!%p1073_p10), %s232_s9, 16, %s234_s12, [#allocation6]  }
  0x17   : > { %1078 = dma.hbm_to_vmem [thread:$0]  (!%p1073_p10), %s246_s15, 512, %s248_s17, [#allocation6], %s1407_s18, %s1407_s18, %s1408_s19  }
  0x18   : > { %p150_p11 = scmp.eq.s32.totalorder %s1485_s27, 1  ;;  %s39_s20 = sadd.s32 1, %s1399_s25 }
  0x19   : > { %p41_p12 = scmp.ge.s32.totalorder %s39_s20, 2  ;;  %s48_s7 = sadd.s32 1, %s1391_s23 }
  0x1a   : > { %p55_p13 = scmp.ne.s32.totalorder %s1391_s23, %s1387_s22  ;;  %p56_p0 = scmp.eq.s32.totalorder %s1403_s26, 0 }
  0x1b   : > { %s1865_s20 = smov (%p41_p12, %s39_s20), 0  ;;  %p1095_p4 = scmp.lt.s32.totalorder %s1403_s26, 2 }
  0x1c   : > { %p1528_p2 = por %p150_p11, %p55_p13  ;;  %s43_s9 = ssub.s32 %s1399_s25, %s1865_s20 }
  0x1d   : > { %s261_s11 = sand.u32 1, %s1391_s23   ;;  %p46_p6 = scmp.eq.s32.totalorder %s43_s9, 0 }
  0x1e   : > { %p57_p9 = por %p56_p0, %p55_p13  ;;  %s1032_s12 = sshll.u32 %s261_s11, 3 }
  0x1f   : > { %s1033_s13 = sshll.u32 %s1399_s25, 3  ;;  %s265_s19 = scalar_lea.vmem [#allocation2], %s1032_s12 }
  0x20   : > { %s1538_s14 = scalar_select %p46_p6, %s1391_s23, %s48_s7  }
  0x21   : > { %s270_s17 = scalar_lea.hbm %s1844_s0, %s1033_s13  ;;  %s274_s28 = sshll.u32 %s265_s19, 4  ;;  %s275_s28 = int_to_ptr.vmem [resolvable:$true] %s274_s28 }
  0x22   : > { %s272_s18 = sshll.u32 %s270_s17, 4  ;;  %p1080_p10 = pnand %p1095_p4, %p57_p9  ;;  %s273_s18 = int_to_ptr.hbm [resolvable:$true] %s272_s18 }
  0x23   : > { %s262_s1 = scalar_lea.sflag [#allocation3], %s261_s11  ;;  %283 = sbr.rel (%p1508_p7) target bundleno = 735 (0x2df), region = 36 }
  0x24   : > { %1082 = dma.hbm_to_vmem [thread:$0]  (!%p1080_p10), %s273_s18, 128, %s275_s28, %s262_s1  }
  0x25   : > { %s1548_s7 = sand.u32 (!%p1508_p7), 1, %s1387_s22  }
  0x26   : > { %s1035_s9 = sshll.u32 (!%p1508_p7), %s1548_s7, 3  ;;  %s286_s13 = scalar_lea.sflag (!%p1508_p7), [#allocation3], %s1548_s7 }
  0x27   : > { %s289_s15 = scalar_lea.vmem (!%p1508_p7), [#allocation2], %s1035_s9 }
  0x28   : > { %1366 = dma.done.wait (%p1495_p3), %s286_s13, 128  }
  0x29   : > { %1368 = vsyncadd (%p1495_p3), %s286_s13, 4294967168 }
  0x2a   : > { %1370 = dma.done.wait (%p62_p1), [#allocation6], 528  }
  0x2b   : > { %1372 = vsyncadd (%p62_p1), [#allocation6], 4294966768  ;;  %vm342_vm0 = vcmask 261120   ;;  %v339_v0 = vld [vmem:[%s289_s15] sm:$0xff]  ;;  %v1409_v2 = vmov 32.0   ;;  %v380_v17 = vld [vmem:[#allocation7] sm:$0xff] }
  0x2c   : > { %v343_v1 = vsel %vm342_vm0, %v339_v0, 0.0  ;;  %1163 = vrcp.f32 %v1409_v2  ;;  %v383_v14 = vld [vmem:[#allocation7 + $0x18] sm:$0xff]  ;;  %v382_v15 = vld [vmem:[#allocation7 + $0x10] sm:$0xff]  ;;  %v381_v16 = vld [vmem:[#allocation7 + $0x8] sm:$0xff]  ;;  %s1410_s29 = smov 104   ;;  %s1411_s10 = smov 112  }
  0x2d   : > { %344 = vadd.xlane.f32.xlu0 %v343_v1  ;;  %399 = vmatpush.msra.mxu0 %v383_v14  ;;  %v1161_v27 = vld [vmem:[#allocation5] ss:$0 sm:$0xff]  ;;  %v1162_v30 = vld [vmem:[%s1846_s2] ss:$0 sm:$0xff]  ;;  %s1412_s11 = smov 96   ;;  %s1413_s12 = smov 120  }
  0x2e   : > { %s1414_s16 = smov 64   ;;  %v1415_v42 = vmov 1983009808   ;;  %vm419_vm5 = vcmask 1047556   ;;  %v1416_v60 = vmov 1934713408  }
  0x2f   : > { %400 = vmatpush.msra.mxu0 %v382_v15  ;;  %v424_v43 = vunpack.c.l.s4 %v1415_v42  ;;  %v448_v61 = vunpack.c.l.s4 %v1416_v60  ;;  %vm529_vm6 = vcmask 64512   ;;  %s1625_s17 = sshll.u32 %s1395_s24, 5  ;;  %s1633_s18 = sshll.u32 %s1548_s7, 5 }
  0x30   : > { %s816_s9 = scalar_lea.hbm %s1848_s4, %s1625_s17  ;;  %s1651_s13 = scalar_lea.vmem [#allocation8], %s1633_s18 }
  0x31   : > { %401 = vmatpush.msra.mxu0 %v381_v16  ;;  %v1566_v47 = vunpack.c.0.s8 %v424_v43  ;;  %s817_s15 = sshll.u32 %s1651_s13, 4  ;;  %s1654_s1 = sshll.u32 %s816_s9, 4  ;;  %s1670_s15 = int_to_ptr.vmem [resolvable:$true] %s817_s15  ;;  %s820_s1 = int_to_ptr.hbm [resolvable:$true] %s1654_s1 }
  0x32   : > { %v1164_v3 = vpop.eup %1163  ;;  %s1277_s9 = scalar_lea.hbm %s1848_s4, 64 }
  0x33   : > { %v347_v4 = vmul.f32 32.0, %v1164_v3  ;;  %vm351_vm1 = vweird.f32 %v1164_v3  ;;  %402 = vmatpush.msra.mxu0 %v380_v17 }
  0x35   : > { %v348_v5 = vsub.f32 1.0, %v347_v4 }
  0x37   : > { %v349_v6 = vmul.f32 %v1164_v3, %v348_v5 }
  0x39   : > { %v350_v7 = vadd.f32 %v1164_v3, %v349_v6 }
  0x3b   : > { %v352_v8 = vsel %vm351_vm1, %v1164_v3, %v350_v7  ;;  %v1580_v7 = vunpack.c.0.s8 %v448_v61 }
  0xa0   : > { %v345_v9 = vpop.xlane.xlu0 %344 }
  0xa1   : > { %v353_v10 = vmul.f32 %v352_v8, %v345_v9 }
  0xa3   : > { %v354_v11 = vsub.f32 %v339_v0, %v353_v10 }
  0xa5   : > { %v355_v12 = vmul.f32 %v354_v11, %v354_v11 }
  0xa7   : > { %v356_v13 = vsel %vm342_vm0, %v355_v12, 0.0 }
  0xa8   : > { %357 = vadd.xlane.f32.xlu0 %v356_v13 }
 0x11b   : > { %v358_v18 = vpop.xlane.xlu0 %357 }
 0x11c   : > { %v359_v19 = vmul.f32 %v358_v18, %v352_v8 }
 0x11e   : > { %v360_v20 = vadd.f32 1e-05, %v359_v19 }
 0x120   : > { %1165 = vrsqrt.f32 %v360_v20  ;;  %vm367_vm3 = vweird.f32 %v360_v20 }
 0x126   : > { %v1166_v21 = vpop.eup %1165 }
 0x127   : > { %v362_v22 = vmul.f32 %v1166_v21, %v360_v20  ;;  %vm368_vm2 = vweird.f32 %v1166_v21 }
 0x128   : > { %vm369_vm4 = vmor %vm367_vm3, %vm368_vm2 }
 0x129   : > { %v363_v23 = vmul.f32 %v1166_v21, %v362_v22 }
 0x12b   : > { %v364_v24 = vmul.f32 0.5, %v363_v23 }
 0x12d   : > { %v365_v25 = vsub.f32 1.5, %v364_v24 }
 0x12f   : > { %v366_v26 = vmul.f32 %v1166_v21, %v365_v25 }
 0x131   : > { %v370_v28 = vsel %vm369_vm4, %v1166_v21, %v366_v26 }
 0x132   : > { %v371_v29 = vmul.f32 %v370_v28, %v354_v11 }
 0x134   : > { %v375_v31 = vmul.f32 %v1161_v27, %v371_v29 }
 0x136   : > { %v379_v32 = vadd.f32 %v1162_v30, %v375_v31 }
 0x138   : > { %1041 = vmatmul.msk.f32.vlgmr.msra.gmra.mxu0 %vm342_vm0, %v379_v32 }
 0x1b5   : > { %v404_v33 = vpop.f32.mrf.mxu0 }
 0x1b6   : > { %539 = vrot.lane.b32.xlu2 %v404_v33, %s1410_s29  ;;  %537 = vrot.lane.b32.xlu1 %v404_v33, %s1411_s10  ;;  %v407_v34 = vmul.f32 0.35355338, %v404_v33 }
 0x1b8   : > { %v421_v46 = vrot.slane %v407_v34, 4 }
 0x1be   : > { %541 = vrot.lane.b32.xlu2 %v404_v33, %s1412_s11  ;;  %535 = vrot.lane.b32.xlu1 %v404_v33, %s1413_s12 }
 0x1c6   : > { %667 = vrot.lane.b32.xlu2 %v404_v33, %s1414_s16  ;;  %412 = vrot.lane.b32.xlu1 %v407_v34, %s1411_s10  ;;  %s834_s10 = scalar_lea.hbm %s1849_s5, %s1625_s17 }
 0x1ce   : > { %409 = vrot.lane.b32.xlu2 %v407_v34, %s1413_s12  ;;  %s1271_s12 = sshra.s32 %s820_s1, 4  ;;  %s1272_s12 = int_to_ptr.hbm [resolvable:$true] %s1271_s12 }
 0x1cf   : > { %p1278_p11 = scmp.lt.s32.totalorder %s1272_s12, %s1848_s4 }
 0x210   : > { %v540_v37 = vpop.permute.xlu2 %539 }
 0x218   : > { %v542_v38 = vpop.permute.xlu2 %541 }
 0x219   : > { %v555_v51 = vrot.slane %v542_v38, 4 }
 0x220   : > { %v668_v39 = vpop.permute.xlu2 %667 }
 0x221   : > { %v681_v54 = vrot.slane %v668_v39, 4 }
 0x228   : > { %v538_v35 = vpop.permute.xlu1 %537  ;;  %v410_v40 = vpop.permute.xlu2 %409 }
 0x229   : > { %545 = vrot.lane.b32.xlu0 %v538_v35, %s1412_s11  ;;  %671 = vrot.lane.b32.xlu1 %v538_v35, %s1414_s16  ;;  %v433_v1 = vrot.slane %v410_v40, 4 }
 0x230   : > { %v536_v36 = vpop.permute.xlu1 %535 }
 0x231   : > { %415 = vrot.lane.b32.xlu0 %v407_v34, %s1410_s29  ;;  %543 = vrot.lane.b32.xlu2 %v536_v36, %s1412_s11 }
 0x232   : > { %547 = vrot.lane.b32.xlu1 %v540_v37, %s1412_s11  ;;  %s794_s11 = scalar_lea.sflag [#allocation4], %s1548_s7 }
 0x238   : > { %v413_v41 = vpop.permute.xlu1 %412 }
 0x239   : > { %673 = vrot.lane.b32.xlu2 %v540_v37, %s1414_s16  ;;  %v418_v45 = vrot.slane %v413_v41, 4  ;;  %v422_v48 = vsel %vm419_vm5, %v413_v41, %v421_v46 }
 0x23a   : > { %669 = vrot.lane.b32.xlu1 %v536_v36, %s1414_s16  ;;  %v430_v55 = vperm.slane %v422_v48, %v1566_v47  ;;  %s1273_s16 = scalar_lea.hbm %s1272_s12, 32 }
 0x23b   : > { %v420_v52 = vsel %vm419_vm5, %v418_v45, %v407_v34  ;;  %p1274_p1 = scmp.ne.s32.totalorder %s1272_s12, %s1273_s16  ;;  %p1279_p12 = scmp.lt.s32.totalorder %s1277_s9, %s1273_s16 }
 0x23c   : > { %v426_v57 = vperm.slane %v420_v52, %v1566_v47  ;;  %v457_v2 = vrot.slane %v430_v55, 4 }
 0x23d   : > { %p1275_p3 = pnand %p1274_p1, %p1528_p2  ;;  %p1280_p13 = por %p1279_p12, %p1278_p11 }
 0x23e   : > { %v445_v4 = vrot.slane %v426_v57, 4 }
 0x23f   : > { %p1276_p7 = pneg %p1275_p3 }
 0x241   : > { %p1281_p0 = pnand %p1280_p13, %p1276_p7 }
 0x28b   : > { %v544_v44 = vpop.permute.xlu2 %543 }
 0x28c   : > { %v567_v5 = vrot.slane %v544_v44, 4 }
 0x293   : > { %v1574_v62 = vpop.permute.xlu2 %673 }
 0x294   : > { %v691_v9 = vrot.slane %v1574_v62, 4 }
 0x29b   : > { %v546_v49 = vpop.permute.xlu0 %545  ;;  %v672_v50 = vpop.permute.xlu1 %671 }
 0x29c   : > { %v553_v53 = vrot.slane %v546_v49, 4  ;;  %v556_v56 = vsel %vm419_vm5, %v546_v49, %v555_v51  ;;  %v679_v59 = vrot.slane %v672_v50, 4  ;;  %v682_v0 = vsel %vm419_vm5, %v672_v50, %v681_v54 }
 0x29d   : > { %v564_v63 = vperm.slane %v556_v56, %v1566_v47  ;;  %v1584_v10 = vperm.slane %v682_v0, %v1566_v47 }
 0x29e   : > { %v554_v58 = vsel %vm419_vm5, %v553_v53, %v542_v38  ;;  %v680_v6 = vsel %vm419_vm5, %v679_v59, %v668_v39 }
 0x29f   : > { %v560_v3 = vperm.slane %v554_v58, %v1566_v47  ;;  %v591_v14 = vrot.slane %v564_v63, 4  ;;  %v1590_v19 = vperm.slane %v680_v6, %v1566_v47 }
 0x2a1   : > { %v579_v18 = vrot.slane %v560_v3, 4 }
 0x2a3   : > { %v416_v8 = vpop.permute.xlu0 %415 }
 0x2a4   : > { %v431_v11 = vrot.slane %v416_v8, 4  ;;  %v434_v12 = vsel %vm419_vm5, %v416_v8, %v433_v1  ;;  %v548_v13 = vpop.permute.xlu1 %547 }
 0x2a5   : > { %v442_v15 = vperm.slane %v434_v12, %v1566_v47  ;;  %v565_v16 = vrot.slane %v548_v13, 4  ;;  %v568_v17 = vsel %vm419_vm5, %v548_v13, %v567_v5 }
 0x2a6   : > { %v432_v20 = vsel %vm419_vm5, %v431_v11, %v410_v40  ;;  %v576_v21 = vperm.slane %v568_v17, %v1566_v47 }
 0x2a7   : > { %v438_v22 = vperm.slane %v432_v20, %v1566_v47  ;;  %v455_v23 = vrot.slane %v442_v15, 4  ;;  %v458_v24 = vsel %vm419_vm5, %v442_v15, %v457_v2  ;;  %v566_v25 = vsel %vm419_vm5, %v565_v16, %v544_v44 }
 0x2a8   : > { %v466_v26 = vperm.slane %v458_v24, %v1580_v7  ;;  %v572_v27 = vperm.slane %v566_v25, %v1566_v47  ;;  %v589_v28 = vrot.slane %v576_v21, 4  ;;  %v592_v29 = vsel %vm419_vm5, %v576_v21, %v591_v14 }
 0x2a9   : > { %v443_v30 = vrot.slane %v438_v22, 4  ;;  %v446_v31 = vsel %vm419_vm5, %v438_v22, %v445_v4  ;;  %v456_v32 = vsel %vm419_vm5, %v455_v23, %v430_v55  ;;  %v600_v33 = vperm.slane %v592_v29, %v1580_v7 }
 0x2aa   : > { %v454_v34 = vperm.slane %v446_v31, %v1580_v7  ;;  %v462_v35 = vperm.slane %v456_v32, %v1580_v7  ;;  %v473_v36 = vrot.slane %v466_v26, 4  ;;  %v577_v37 = vrot.slane %v572_v27, 4 }
 0x2ab   : > { %v444_v38 = vsel %vm419_vm5, %v443_v30, %v426_v57  ;;  %v580_v39 = vsel %vm419_vm5, %v572_v27, %v579_v18  ;;  %v590_v40 = vsel %vm419_vm5, %v589_v28, %v564_v63  ;;  %v607_v41 = vrot.slane %v600_v33, 4 }
 0x2ac   : > { %v450_v42 = vperm.slane %v444_v38, %v1580_v7  ;;  %v469_v43 = vrot.slane %v454_v34, 4  ;;  %v471_v44 = vrot.slane %v462_v35, 4  ;;  %v474_v45 = vsel %vm419_vm5, 0.0, %v473_v36  ;;  %v670_v32 = vpop.permute.xlu1 %669 }
 0x2ad   : > { %v486_v46 = vsel %vm419_vm5, %v473_v36, %v462_v35  ;;  %v491_v48 = vrot.slane %v474_v45, 4  ;;  %v578_v49 = vsel %vm419_vm5, %v577_v37, %v560_v3  ;;  %v588_v50 = vperm.slane %v580_v39, %v1580_v7 }
 0x2ae   : > { %v467_v51 = vrot.slane %v450_v42, 4  ;;  %v470_v52 = vsel %vm419_vm5, 0.0, %v469_v43  ;;  %v472_v53 = vsel %vm419_vm5, 0.0, %v471_v44  ;;  %v475_v54 = vsel %vm419_vm5, %v469_v43, %v450_v42 }
 0x2af   : > { %v479_v55 = vperm.slane %v475_v54, %v1566_v47  ;;  %v480_v56 = vrot.slane %v470_v52, 4  ;;  %v490_v57 = vperm.slane %v486_v46, %v1566_v47  ;;  %v492_v58 = vsel %vm419_vm5, %v491_v48, %v472_v53 }
 0x2b0   : > { %v468_v59 = vsel %vm419_vm5, 0.0, %v467_v51  ;;  %v496_v60 = vperm.slane %v492_v58, %v1566_v47  ;;  %v584_v61 = vperm.slane %v578_v49, %v1580_v7  ;;  %v596_v63 = vperm.slane %v590_v40, %v1580_v7 }
 0x2b1   : > { %v481_v0 = vsel %vm419_vm5, %v480_v56, %v468_v59  ;;  %v499_v1 = vrot.slane %v479_v55, 4  ;;  %v511_v2 = vrot.slane %v490_v57, 4  ;;  %v603_v3 = vrot.slane %v588_v50, 4 }
 0x2b2   : > { %v485_v4 = vperm.slane %v481_v0, %v1566_v47  ;;  %v509_v5 = vrot.slane %v496_v60, 4  ;;  %v601_v6 = vrot.slane %v584_v61, 4  ;;  %v605_v8 = vrot.slane %v596_v63, 4 }
 0x2b3   : > { %v512_v11 = vsel %vm419_vm5, %v496_v60, %v511_v2  ;;  %v604_v12 = vsel %vm419_vm5, 0.0, %v603_v3  ;;  %v608_v13 = vsel %vm419_vm5, 0.0, %v607_v41  ;;  %v609_v14 = vsel %vm419_vm5, %v603_v3, %v584_v61 }
 0x2b4   : > { %v497_v15 = vrot.slane %v485_v4, 4  ;;  %v500_v16 = vsel %vm419_vm5, %v485_v4, %v499_v1  ;;  %v510_v17 = vsel %vm419_vm5, %v509_v5, %v490_v57  ;;  %v520_v18 = vperm.slane %v512_v11, %v1580_v7 }
 0x2b5   : > { %v508_v20 = vperm.slane %v500_v16, %v1580_v7  ;;  %v516_v21 = vperm.slane %v510_v17, %v1580_v7  ;;  %v602_v22 = vsel %vm419_vm5, 0.0, %v601_v6  ;;  %v606_v23 = vsel %vm419_vm5, 0.0, %v605_v8 }
 0x2b6   : > { %v498_v24 = vsel %vm419_vm5, %v497_v15, %v479_v55  ;;  %v525_v25 = vrot.slane %v520_v18, 4  ;;  %v613_v26 = vperm.slane %v609_v14, %v1566_v47  ;;  %v614_v27 = vrot.slane %v604_v12, 4 }
 0x2b7   : > { %v504_v28 = vperm.slane %v498_v24, %v1580_v7  ;;  %v521_v29 = vrot.slane %v516_v21, 4  ;;  %v527_v30 = vrot.slane %v508_v20, 4  ;;  %v620_v31 = vsel %vm419_vm5, %v607_v41, %v596_v63 }
 0x2b8   : > { %v526_v33 = vsel %vm419_vm5, %v525_v25, %v508_v20  ;;  %v615_v34 = vsel %vm419_vm5, %v614_v27, %v602_v22  ;;  %v624_v35 = vperm.slane %v620_v31, %v1566_v47  ;;  %v625_v36 = vrot.slane %v608_v13, 4 }
 0x2b9   : > { %v522_v37 = vsel %vm419_vm5, %v521_v29, %v504_v28  ;;  %v523_v38 = vrot.slane %v504_v28, 4  ;;  %v528_v39 = vsel %vm419_vm5, %v520_v18, %v527_v30  ;;  %v619_v40 = vperm.slane %v615_v34, %v1566_v47  ;;  %532 = vst.msk [vmem:[%s1651_s13 + $0x10] sm:$0xff] %vm529_vm6, %v526_v33 }
 0x2ba   : > { %v626_v41 = vsel %vm419_vm5, %v625_v36, %v606_v23  ;;  %v633_v42 = vrot.slane %v613_v26, 4  ;;  %v645_v43 = vrot.slane %v624_v35, 4  ;;  %v692_v44 = vsel %vm419_vm5, %v691_v9, %v670_v32  ;;  %530 = vst.msk [vmem:[%s1651_s13] sm:$0xff] %vm529_vm6, %v522_v37 }
 0x2bb   : > { %v524_v45 = vsel %vm419_vm5, %v516_v21, %v523_v38  ;;  %v630_v46 = vperm.slane %v626_v41, %v1566_v47  ;;  %v631_v48 = vrot.slane %v619_v40, 4  ;;  %v693_v49 = vrot.slane %v670_v32, 4  ;;  %533 = vst.msk [vmem:[%s1651_s13 + $0x18] sm:$0xff] %vm529_vm6, %v528_v39 }
 0x2bc   : > { %v705_v50 = vrot.slane %v1590_v19, 4  ;;  %v717_v9 = vrot.slane %v1584_v10, 4  ;;  %v634_v51 = vsel %vm419_vm5, %v619_v40, %v633_v42  ;;  %v698_v52 = vperm.slane %v692_v44, %v1566_v47  ;;  %531 = vst.msk [vmem:[%s1651_s13 + $0x8] sm:$0xff] %vm529_vm6, %v524_v45 }
 0x2bd   : > { %v632_v53 = vsel %vm419_vm5, %v631_v48, %v613_v26  ;;  %v642_v54 = vperm.slane %v634_v51, %v1580_v7  ;;  %v643_v55 = vrot.slane %v630_v46, 4  ;;  %v646_v56 = vsel %vm419_vm5, %v630_v46, %v645_v43 }
 0x2be   : > { %1284 = shalt.err (!%p1281_p0)
}
 0x2bf   : > { %s1417_s7 = smov 128   ;;  %s1418_s29 = smov 8   ;;  %v638_v57 = vperm.slane %v632_v53, %v1580_v7  ;;  %v654_v58 = vperm.slane %v646_v56, %v1580_v7  ;;  %v694_v59 = vsel %vm419_vm5, %v1574_v62, %v693_v49  ;;  %v703_v60 = vrot.slane %v698_v52, 4 }
 0x2c0   : > { %1066 = dma.vmem_to_hbm [thread:$0]  (%p1528_p2), %s1670_s15, 512, %s820_s1, %s794_s11, %s1417_s7, %s1417_s7, %s1418_s29   ;;  %v644_v61 = vsel %vm419_vm5, %v643_v55, %v624_v35  ;;  %v661_v63 = vrot.slane %v642_v54, 4  ;;  %v702_v0 = vperm.slane %v694_v59, %v1566_v47  ;;  %v706_v1 = vsel %vm419_vm5, %v698_v52, %v705_v50 }
 0x2c1   : > { %s798_s12 = sand.u32 1, %s1485_s27   ;;  %v650_v2 = vperm.slane %v644_v61, %v1580_v7  ;;  %v657_v3 = vrot.slane %v638_v57, 4  ;;  %v659_v4 = vrot.slane %v654_v58, 4  ;;  %v704_v5 = vsel %vm419_vm5, %v703_v60, %v1590_v19  ;;  %s331_s15 = scalar_lea.vmem [#allocation9], %s1633_s18 }
 0x2c2   : > { %s835_s1 = sshll.u32 %s331_s15, 4  ;;  %s1726_s24 = sshll.u32 %s834_s10, 4  ;;  %v662_v62 = vsel %vm419_vm5, %v654_v58, %v661_v63  ;;  %v710_v6 = vperm.slane %v704_v5, %v1580_v7  ;;  %v714_v8 = vperm.slane %v706_v1, %v1580_v7  ;;  %v715_v11 = vrot.slane %v702_v0, 4  ;;  %s1739_s1 = int_to_ptr.vmem [resolvable:$true] %s835_s1  ;;  %s838_s24 = int_to_ptr.hbm [resolvable:$true] %s1726_s24 }
 0x2c3   : > { %v655_v12 = vrot.slane %v650_v2, 4  ;;  %v658_v13 = vsel %vm419_vm5, %v650_v2, %v657_v3  ;;  %v660_v19 = vsel %vm419_vm5, %v659_v4, %v642_v54  ;;  %v718_v14 = vsel %vm419_vm5, %v702_v0, %v717_v9  ;;  %666 = vst.msk [vmem:[%s331_s15 + $0x18] sm:$0xff] %vm529_vm6, %v662_v62  ;;  %s1752_s10 = scalar_lea.sflag [#allocation10], %s798_s12  ;;  %s1299_s19 = sshra.s32 %s838_s24, 4  ;;  %s1300_s19 = int_to_ptr.hbm [resolvable:$true] %s1299_s19 }
 0x2c4   : > { %v716_v15 = vsel %vm419_vm5, %v715_v11, %v1584_v10  ;;  %v726_v16 = vperm.slane %v718_v14, %v1580_v7  ;;  %v727_v17 = vrot.slane %v710_v6, 4  ;;  %v729_v18 = vrot.slane %v714_v8, 4  ;;  %664 = vst.msk [vmem:[%s331_s15 + $0x8] sm:$0xff] %vm529_vm6, %v658_v13  ;;  %s1301_s9 = scalar_lea.hbm %s1300_s19, 32  ;;  %s1305_s11 = scalar_lea.hbm %s1849_s5, 64 }
 0x2c5   : > { %v656_v20 = vsel %vm419_vm5, %v655_v12, %v638_v57  ;;  %v722_v21 = vperm.slane %v716_v15, %v1580_v7  ;;  %665 = vst.msk [vmem:[%s331_s15 + $0x10] sm:$0xff] %vm529_vm6, %v660_v19  ;;  %p1302_p4 = scmp.ne.s32.totalorder %s1300_s19, %s1301_s9  ;;  %p1306_p10 = scmp.lt.s32.totalorder %s1300_s19, %s1849_s5 }
 0x2c6   : > { %v728_v10 = vsel %vm419_vm5, 0.0, %v727_v17  ;;  %v730_v22 = vsel %vm419_vm5, 0.0, %v729_v18  ;;  %v733_v23 = vrot.slane %v726_v16, 4  ;;  %v735_v24 = vsel %vm419_vm5, %v729_v18, %v710_v6  ;;  %663 = vst.msk [vmem:[%s331_s15] sm:$0xff] %vm529_vm6, %v656_v20  ;;  %p1307_p1 = scmp.lt.s32.totalorder %s1305_s11, %s1301_s9 }
 0x2c7   : > { %v731_v25 = vrot.slane %v722_v21, 4  ;;  %v739_v26 = vperm.slane %v735_v24, %v1566_v47  ;;  %v740_v27 = vrot.slane %v730_v22, 4  ;;  %p1303_p6 = pnand %p1302_p4, %p1528_p2 }
 0x2c8   : > { %p1308_p3 = por %p1307_p1, %p1306_p10 }
 0x2c9   : > { %p1304_p9 = pneg %p1303_p6 }
 0x2cb   : > { %p1309_p7 = pnand %p1308_p3, %p1304_p9 }
 0x2cd   : > { %1312 = shalt.err (!%p1309_p7)
}
 0x2ce   : > { %1067 = dma.vmem_to_hbm [thread:$0]  (%p1528_p2), %s1739_s1, 512, %s838_s24, %s1752_s10, %s1417_s7, %s1417_s7, %s1418_s29   ;;  %v734_v28 = vsel %vm419_vm5, 0.0, %v733_v23  ;;  %v746_v29 = vsel %vm419_vm5, %v733_v23, %v722_v21  ;;  %v732_v30 = vsel %vm419_vm5, 0.0, %v731_v25  ;;  %v741_v31 = vsel %vm419_vm5, %v740_v27, %v728_v10 }
 0x2cf   : > { %v750_v32 = vperm.slane %v746_v29, %v1566_v47  ;;  %v751_v33 = vrot.slane %v734_v28, 4  ;;  %v745_v34 = vperm.slane %v741_v31, %v1566_v47  ;;  %v759_v35 = vrot.slane %v739_v26, 4  ;;  %s852_s1 = scalar_lea.hbm %s1850_s6, %s1625_s17  ;;  %s338_s19 = scalar_lea.vmem [#allocation11], %s1633_s18 }
 0x2d0   : > { %s1794_s24 = sshll.u32 %s852_s1, 4  ;;  %s853_s9 = sshll.u32 %s338_s19, 4  ;;  %s854_s9 = int_to_ptr.vmem [resolvable:$true] %s853_s9  ;;  %s856_s24 = int_to_ptr.hbm [resolvable:$true] %s1794_s24 }
 0x2d1   : > { %v752_v36 = vsel %vm419_vm5, %v751_v33, %v732_v30  ;;  %v771_v37 = vrot.slane %v750_v32, 4  ;;  %v757_v39 = vrot.slane %v745_v34, 4  ;;  %v760_v40 = vsel %vm419_vm5, %v745_v34, %v759_v35  ;;  %s1327_s17 = sshra.s32 %s856_s24, 4  ;;  %s1333_s11 = scalar_lea.hbm %s1850_s6, 64  ;;  %s1328_s17 = int_to_ptr.hbm [resolvable:$true] %s1327_s17 }
 0x2d2   : > { %v756_v38 = vperm.slane %v752_v36, %v1566_v47  ;;  %v768_v41 = vperm.slane %v760_v40, %v1580_v7  ;;  %s1329_s18 = scalar_lea.hbm %s1328_s17, 32  ;;  %p1334_p0 = scmp.lt.s32.totalorder %s1328_s17, %s1850_s6 }
 0x2d3   : > { %v758_v42 = vsel %vm419_vm5, %v757_v39, %v739_v26  ;;  %p1330_p11 = scmp.ne.s32.totalorder %s1328_s17, %s1329_s18  ;;  %p1335_p4 = scmp.lt.s32.totalorder %s1333_s11, %s1329_s18 }
 0x2d4   : > { %v769_v43 = vrot.slane %v756_v38, 4  ;;  %v772_v44 = vsel %vm419_vm5, %v756_v38, %v771_v37  ;;  %v764_v45 = vperm.slane %v758_v42, %v1580_v7  ;;  %v787_v47 = vrot.slane %v768_v41, 4 }
 0x2d5   : > { %v780_v46 = vperm.slane %v772_v44, %v1580_v7  ;;  %p1331_p12 = pnand %p1330_p11, %p1528_p2  ;;  %p1336_p6 = por %p1335_p4, %p1334_p0 }
 0x2d6   : > { %v770_v48 = vsel %vm419_vm5, %v769_v43, %v750_v32  ;;  %v783_v50 = vrot.slane %v764_v45, 4 }
 0x2d7   : > { %v776_v49 = vperm.slane %v770_v48, %v1580_v7  ;;  %v785_v9 = vrot.slane %v780_v46, 4  ;;  %v788_v51 = vsel %vm419_vm5, %v780_v46, %v787_v47  ;;  %p1332_p13 = pneg %p1331_p12 }
 0x2d8   : > { %792 = vst.msk [vmem:[%s338_s19 + $0x18] sm:$0xff] %vm529_vm6, %v788_v51 }
 0x2d9   : > { %v781_v52 = vrot.slane %v776_v49, 4  ;;  %v784_v53 = vsel %vm419_vm5, %v776_v49, %v783_v50  ;;  %v786_v54 = vsel %vm419_vm5, %v785_v9, %v768_v41  ;;  %p1337_p9 = pnand %p1336_p6, %p1332_p13 }
 0x2da   : > { %790 = vst.msk [vmem:[%s338_s19 + $0x8] sm:$0xff] %vm529_vm6, %v784_v53 }
 0x2db   : > { %v782_v7 = vsel %vm419_vm5, %v781_v52, %v764_v45  ;;  %791 = vst.msk [vmem:[%s338_s19 + $0x10] sm:$0xff] %vm529_vm6, %v786_v54 }
 0x2dc   : > { %789 = vst.msk [vmem:[%s338_s19] sm:$0xff] %vm529_vm6, %v782_v7 }
 0x2dd   : > { %1340 = shalt.err (!%p1337_p9)
}
 0x2de   : > { %1068 = dma.vmem_to_hbm [thread:$0]  (%p1528_p2), %s854_s9, 512, %s856_s24, %s1752_s10, %s1417_s7, %s1417_s7, %s1418_s29  }
 0x2df PF: > { %s870_s27 = sand.u32 1, %s1383_s21   ;;  %p1084_p10 = pnand %p1031_p8, %p1500_p5 }
 0x2e0   : > { %s871_s12 = scalar_lea.sflag [#allocation4], %s870_s27 }
 0x2e1   : > { %p1085_p1 = pneg %p1084_p10 }
 0x2e3   : > { %1374 = dma.done.wait (%p1085_p1), %s871_s12, 512  }
 0x2e4   : > { %1376 = vsyncadd (%p1085_p1), %s871_s12, 4294966784  ;;  %s1858_s1 = sadd.s32 4294967294, %s1403_s26  }
 0x2e5   : > { %s880_s8 = sand.u32 1, %s1858_s1  }
 0x2e6   : > { %s881_s19 = scalar_lea.sflag [#allocation10], %s880_s8 }
 0x2e7   : > { %1378 = dma.done.wait (%p1085_p1), %s881_s19, 1024  }
 0x2e8   : > { %1380 = vsyncadd (%p1085_p1), %s881_s19, 4294966272  ;;  %s27_s26 = sadd.s32 1, %s1403_s26   ;;  %s1859_s21 = smov %s1387_s22 }
 0x2e9   : > { %p24_p2 = scmp.ge.s32.totalorder %s27_s26, 4   ;;  %s1860_s22 = smov %s1391_s23 }
 0x2ea   : > { %s1861_s23 = smov %s1538_s14  ;;  %s1862_s24 = smov %s1399_s25 }
 0x2eb   : > { %s1863_s25 = smov %s1865_s20  ;;  %26 = sbr.rel (!%p24_p2) target bundleno = 11 (0xb), region = 121 }
 0x2f0   :  { %897 = vsyncpa [#allocation3], 1 }
 0x2f1   :  { %899 = vsyncpa [#allocation3 + $0x1], 1 }
 0x2f2   :  { %900 = vsyncpa [#allocation6], 1 }
 0x2f3   :  { %901 = vsyncpa [#allocation4], 1 }
 0x2f4   :  { %903 = vsyncpa [#allocation4 + $0x1], 1 }
 0x2f5   :  { %904 = vsyncpa [#allocation10], 1 }
 0x2f6   :  { %906 = vsyncpa [#allocation10 + $0x1], 1 }

// kernel: tpu_custom_call.1
= control target key start
LH: loop header
LB: loop body
LE: loop exit
PB: predicated region body
PF: predicated region fallthrough
CT: control target
= control target key end

     0   :  { %s1844_s0 = inlined_call_operand.hbm [shape: f32[2,8,32], index: 0, kind: input, shape index: {}]   ;;  %s1845_s1 = inlined_call_operand.hbm [shape: f32[1,32], index: 1, kind: input, shape index: {}]   ;;  %s1846_s2 = inlined_call_operand.vmem [shape: f32[1,32], index: 2, kind: input, shape index: {}]   ;;  %s1847_s3 = inlined_call_operand.hbm [shape: f32[32,96], index: 3, kind: input, shape index: {}]   ;;  %s1848_s4 = inlined_call_operand.hbm [shape: f32[2,4,8,8], index: 4, kind: output, shape index: {0}]   ;;  %s1849_s5 = inlined_call_operand.hbm [shape: f32[2,4,8,8], index: 5, kind: output, shape index: {1}]   ;;  %s1850_s6 = inlined_call_operand.hbm [shape: f32[2,4,8,8], index: 6, kind: output, shape index: {2}]  }
   0x1   :  { %1852 = sst [smem:[#allocation16_spill]] %s1845_s1 }
   0x2   :  { %12 = vsyncpa [#allocation3], 0 }
   0x3   :  { %14 = vsyncpa [#allocation3 + $0x1], 0 }
   0x4   :  { %15 = vsyncpa [#allocation6], 0 }
   0x5   :  { %16 = vsyncpa [#allocation4], 0 }
   0x6   :  { %18 = vsyncpa [#allocation4 + $0x1], 0 }
   0x7   :  { %19 = vsyncpa [#allocation10], 0 }
   0x8   :  { %21 = vsyncpa [#allocation10 + $0x1], 0  ;;  %s1454_s21 = smov 0   ;;  %s1456_s22 = smov 0  }
   0x9   :  { %s1458_s23 = smov 0   ;;  %s1460_s24 = smov 0  }
   0xa   :  { %s1462_s25 = smov 0   ;;  %s1464_s26 = smov 0  }
   0xb LB: > { %s1485_s27 = sadd.s32 4294967295, %s1403_s26   ;;  %s1851_s28 = sadd.s32 4294967294, %s1403_s26   ;;  %s1403_s26 = sphi %s1464_s26, %s27_s26   ;;  %s1399_s25 = sphi %s1462_s25, %s1863_s25   ;;  %s1395_s24 = sphi %s1460_s24, %s1862_s24   ;;  %s1391_s23 = sphi %s1458_s23, %s1861_s23   ;;  %s1387_s22 = sphi %s1456_s22, %s1860_s22   ;;  %s1383_s21 = sphi %s1454_s21, %s1859_s21  }
   0xc   : > { %p61_p0 = scmp.ne.s32.totalorder %s1387_s22, %s1383_s21  ;;  %p62_p1 = scmp.eq.s32.totalorder %s1485_s27, 0 }
   0xd   : > { %p156_p2 = scmp.eq.s32.totalorder %s1851_s28, 1  ;;  %p1028_p4 = scmp.ge.s32.totalorder %s1403_s26, 1 }
   0xe   : > { %p1495_p3 = por %p62_p1, %p61_p0  ;;  %p219_p6 = scmp.lt.s32.totalorder %s1403_s26, 3 }
   0xf   : > { %p1500_p5 = por %p156_p2, %p61_p0  ;;  %s1855_s1 = sld [smem:[#allocation16_spill]] }
  0x10   : > { %p1508_p7 = pnand %p1028_p4, %p219_p6  ;;  %p1031_p8 = scmp.ge.s32.totalorder %s1403_s26, 2 }
  0x11   : > { %s1405_s11 = smov [#allocation5]   ;;  %s245_s15 = sshll.u32 %s1847_s3, 4  ;;  %s246_s15 = int_to_ptr.hbm [resolvable:$true] %s245_s15 }
  0x12   : > { %p1072_p9 = pneg %p1508_p7  ;;  %s233_s12 = sshll.u32 %s1405_s11, 4  ;;  %s234_s12 = int_to_ptr.vmem [resolvable:$true] %s233_s12 }
  0x13   : > { %s1406_s16 = smov [#allocation7]   ;;  %s1407_s18 = smov 128  }
  0x14   : > { %p1073_p10 = pnand %p1072_p9, %p62_p1  ;;  %s247_s17 = sshll.u32 %s1406_s16, 4  ;;  %s248_s17 = int_to_ptr.vmem [resolvable:$true] %s247_s17 }
  0x15   : > { %s231_s9 = sshll.u32 %s1855_s1, 4  ;;  %s1408_s19 = smov 8   ;;  %s232_s9 = int_to_ptr.hbm [resolvable:$true] %s231_s9 }
  0x16   : > { %1075 = dma.hbm_to_vmem [thread:$0]  (!%p1073_p10), %s232_s9, 16, %s234_s12, [#allocation6]  }
  0x17   : > { %1078 = dma.hbm_to_vmem [thread:$0]  (!%p1073_p10), %s246_s15, 512, %s248_s17, [#allocation6], %s1407_s18, %s1407_s18, %s1408_s19  }
  0x18   : > { %p150_p11 = scmp.eq.s32.totalorder %s1485_s27, 1  ;;  %s39_s20 = sadd.s32 1, %s1399_s25 }
  0x19   : > { %p41_p12 = scmp.ge.s32.totalorder %s39_s20, 2  ;;  %s48_s7 = sadd.s32 1, %s1391_s23 }
  0x1a   : > { %p55_p13 = scmp.ne.s32.totalorder %s1391_s23, %s1387_s22  ;;  %p56_p0 = scmp.eq.s32.totalorder %s1403_s26, 0 }
  0x1b   : > { %s1865_s20 = smov (%p41_p12, %s39_s20), 0  ;;  %p1095_p4 = scmp.lt.s32.totalorder %s1403_s26, 2 }
  0x1c   : > { %p1528_p2 = por %p150_p11, %p55_p13  ;;  %s43_s9 = ssub.s32 %s1399_s25, %s1865_s20 }
  0x1d   : > { %s261_s11 = sand.u32 1, %s1391_s23   ;;  %p46_p6 = scmp.eq.s32.totalorder %s43_s9, 0 }
  0x1e   : > { %p57_p9 = por %p56_p0, %p55_p13  ;;  %s1032_s12 = sshll.u32 %s261_s11, 3 }
  0x1f   : > { %s1033_s13 = sshll.u32 %s1399_s25, 3  ;;  %s265_s19 = scalar_lea.vmem [#allocation2], %s1032_s12 }
  0x20   : > { %s1538_s14 = scalar_select %p46_p6, %s1391_s23, %s48_s7  }
  0x21   : > { %s270_s17 = scalar_lea.hbm %s1844_s0, %s1033_s13  ;;  %s274_s28 = sshll.u32 %s265_s19, 4  ;;  %s275_s28 = int_to_ptr.vmem [resolvable:$true] %s274_s28 }
  0x22   : > { %s272_s18 = sshll.u32 %s270_s17, 4  ;;  %p1080_p10 = pnand %p1095_p4, %p57_p9  ;;  %s273_s18 = int_to_ptr.hbm [resolvable:$true] %s272_s18 }
  0x23   : > { %s262_s1 = scalar_lea.sflag [#allocation3], %s261_s11  ;;  %283 = sbr.rel (%p1508_p7) target bundleno = 735 (0x2df), region = 36 }
  0x24   : > { %1082 = dma.hbm_to_vmem [thread:$0]  (!%p1080_p10), %s273_s18, 128, %s275_s28, %s262_s1  }
  0x25   : > { %s1548_s7 = sand.u32 (!%p1508_p7), 1, %s1387_s22  }
  0x26   : > { %s1035_s9 = sshll.u32 (!%p1508_p7), %s1548_s7, 3  ;;  %s286_s13 = scalar_lea.sflag (!%p1508_p7), [#allocation3], %s1548_s7 }
  0x27   : > { %s289_s15 = scalar_lea.vmem (!%p1508_p7), [#allocation2], %s1035_s9 }
  0x28   : > { %1366 = dma.done.wait (%p1495_p3), %s286_s13, 128  }
  0x29   : > { %1368 = vsyncadd (%p1495_p3), %s286_s13, 4294967168 }
  0x2a   : > { %1370 = dma.done.wait (%p62_p1), [#allocation6], 528  }
  0x2b   : > { %1372 = vsyncadd (%p62_p1), [#allocation6], 4294966768  ;;  %vm342_vm0 = vcmask 261120   ;;  %v339_v0 = vld [vmem:[%s289_s15] sm:$0xff]  ;;  %v1409_v2 = vmov 32.0   ;;  %v380_v17 = vld [vmem:[#allocation7] sm:$0xff] }
  0x2c   : > { %v343_v1 = vsel %vm342_vm0, %v339_v0, 0.0  ;;  %1163 = vrcp.f32 %v1409_v2  ;;  %v383_v14 = vld [vmem:[#allocation7 + $0x18] sm:$0xff]  ;;  %v382_v15 = vld [vmem:[#allocation7 + $0x10] sm:$0xff]  ;;  %v381_v16 = vld [vmem:[#allocation7 + $0x8] sm:$0xff]  ;;  %s1410_s29 = smov 104   ;;  %s1411_s10 = smov 112  }
  0x2d   : > { %344 = vadd.xlane.f32.xlu0 %v343_v1  ;;  %399 = vmatpush.msra.mxu0 %v383_v14  ;;  %v1161_v27 = vld [vmem:[#allocation5] ss:$0 sm:$0xff]  ;;  %v1162_v30 = vld [vmem:[%s1846_s2] ss:$0 sm:$0xff]  ;;  %s1412_s11 = smov 96   ;;  %s1413_s12 = smov 120  }
  0x2e   : > { %s1414_s16 = smov 64   ;;  %v1415_v42 = vmov 1983009808   ;;  %vm419_vm5 = vcmask 1047556   ;;  %v1416_v60 = vmov 1934713408  }
  0x2f   : > { %400 = vmatpush.msra.mxu0 %v382_v15  ;;  %v424_v43 = vunpack.c.l.s4 %v1415_v42  ;;  %v448_v61 = vunpack.c.l.s4 %v1416_v60  ;;  %vm529_vm6 = vcmask 64512   ;;  %s1625_s17 = sshll.u32 %s1395_s24, 5  ;;  %s1633_s18 = sshll.u32 %s1548_s7, 5 }
  0x30   : > { %s816_s9 = scalar_lea.hbm %s1848_s4, %s1625_s17  ;;  %s1651_s13 = scalar_lea.vmem [#allocation8], %s1633_s18 }
  0x31   : > { %401 = vmatpush.msra.mxu0 %v381_v16  ;;  %v1566_v47 = vunpack.c.0.s8 %v424_v43  ;;  %s817_s15 = sshll.u32 %s1651_s13, 4  ;;  %s1654_s1 = sshll.u32 %s816_s9, 4  ;;  %s1670_s15 = int_to_ptr.vmem [resolvable:$true] %s817_s15  ;;  %s820_s1 = int_to_ptr.hbm [resolvable:$true] %s1654_s1 }
  0x32   : > { %v1164_v3 = vpop.eup %1163  ;;  %s1277_s9 = scalar_lea.hbm %s1848_s4, 64 }
  0x33   : > { %v347_v4 = vmul.f32 32.0, %v1164_v3  ;;  %vm351_vm1 = vweird.f32 %v1164_v3  ;;  %402 = vmatpush.msra.mxu0 %v380_v17 }
  0x35   : > { %v348_v5 = vsub.f32 1.0, %v347_v4 }
  0x37   : > { %v349_v6 = vmul.f32 %v1164_v3, %v348_v5 }
  0x39   : > { %v350_v7 = vadd.f32 %v1164_v3, %v349_v6 }
  0x3b   : > { %v352_v8 = vsel %vm351_vm1, %v1164_v3, %v350_v7  ;;  %v1580_v7 = vunpack.c.0.s8 %v448_v61 }
  0xa0   : > { %v345_v9 = vpop.xlane.xlu0 %344 }
  0xa1   : > { %v353_v10 = vmul.f32 %v352_v8, %v345_v9 }
  0xa3   : > { %v354_v11 = vsub.f32 %v339_v0, %v353_v10 }
  0xa5   : > { %v355_v12 = vmul.f32 %v354_v11, %v354_v11 }
  0xa7   : > { %v356_v13 = vsel %vm342_vm0, %v355_v12, 0.0 }
  0xa8   : > { %357 = vadd.xlane.f32.xlu0 %v356_v13 }
 0x11b   : > { %v358_v18 = vpop.xlane.xlu0 %357 }
 0x11c   : > { %v359_v19 = vmul.f32 %v358_v18, %v352_v8 }
 0x11e   : > { %v360_v20 = vadd.f32 1e-05, %v359_v19 }
 0x120   : > { %1165 = vrsqrt.f32 %v360_v20  ;;  %vm367_vm3 = vweird.f32 %v360_v20 }
 0x126   : > { %v1166_v21 = vpop.eup %1165 }
 0x127   : > { %v362_v22 = vmul.f32 %v1166_v21, %v360_v20  ;;  %vm368_vm2 = vweird.f32 %v1166_v21 }
 0x128   : > { %vm369_vm4 = vmor %vm367_vm3, %vm368_vm2 }
 0x129   : > { %v363_v23 = vmul.f32 %v1166_v21, %v362_v22 }
 0x12b   : > { %v364_v24 = vmul.f32 0.5, %v363_v23 }
 0x12d   : > { %v365_v25 = vsub.f32 1.5, %v364_v24 }
 0x12f   : > { %v366_v26 = vmul.f32 %v1166_v21, %v365_v25 }
 0x131   : > { %v370_v28 = vsel %vm369_vm4, %v1166_v21, %v366_v26 }
 0x132   : > { %v371_v29 = vmul.f32 %v370_v28, %v354_v11 }
 0x134   : > { %v375_v31 = vmul.f32 %v1161_v27, %v371_v29 }
 0x136   : > { %v379_v32 = vadd.f32 %v1162_v30, %v375_v31 }
 0x138   : > { %1041 = vmatmul.msk.f32.vlgmr.msra.gmra.mxu0 %vm342_vm0, %v379_v32 }
 0x1b5   : > { %v404_v33 = vpop.f32.mrf.mxu0 }
 0x1b6   : > { %539 = vrot.lane.b32.xlu2 %v404_v33, %s1410_s29  ;;  %537 = vrot.lane.b32.xlu1 %v404_v33, %s1411_s10  ;;  %v407_v34 = vmul.f32 0.35355338, %v404_v33 }
 0x1b8   : > { %v421_v46 = vrot.slane %v407_v34, 4 }
 0x1be   : > { %541 = vrot.lane.b32.xlu2 %v404_v33, %s1412_s11  ;;  %535 = vrot.lane.b32.xlu1 %v404_v33, %s1413_s12 }
 0x1c6   : > { %667 = vrot.lane.b32.xlu2 %v404_v33, %s1414_s16  ;;  %412 = vrot.lane.b32.xlu1 %v407_v34, %s1411_s10  ;;  %s834_s10 = scalar_lea.hbm %s1849_s5, %s1625_s17 }
 0x1ce   : > { %409 = vrot.lane.b32.xlu2 %v407_v34, %s1413_s12  ;;  %s1271_s12 = sshra.s32 %s820_s1, 4  ;;  %s1272_s12 = int_to_ptr.hbm [resolvable:$true] %s1271_s12 }
 0x1cf   : > { %p1278_p11 = scmp.lt.s32.totalorder %s1272_s12, %s1848_s4 }
 0x210   : > { %v540_v37 = vpop.permute.xlu2 %539 }
 0x218   : > { %v542_v38 = vpop.permute.xlu2 %541 }
 0x219   : > { %v555_v51 = vrot.slane %v542_v38, 4 }
 0x220   : > { %v668_v39 = vpop.permute.xlu2 %667 }
 0x221   : > { %v681_v54 = vrot.slane %v668_v39, 4 }
 0x228   : > { %v538_v35 = vpop.permute.xlu1 %537  ;;  %v410_v40 = vpop.permute.xlu2 %409 }
 0x229   : > { %545 = vrot.lane.b32.xlu0 %v538_v35, %s1412_s11  ;;  %671 = vrot.lane.b32.xlu1 %v538_v35, %s1414_s16  ;;  %v433_v1 = vrot.slane %v410_v40, 4 }
 0x230   : > { %v536_v36 = vpop.permute.xlu1 %535 }
 0x231   : > { %415 = vrot.lane.b32.xlu0 %v407_v34, %s1410_s29  ;;  %543 = vrot.lane.b32.xlu2 %v536_v36, %s1412_s11 }
 0x232   : > { %547 = vrot.lane.b32.xlu1 %v540_v37, %s1412_s11  ;;  %s794_s11 = scalar_lea.sflag [#allocation4], %s1548_s7 }
 0x238   : > { %v413_v41 = vpop.permute.xlu1 %412 }
 0x239   : > { %673 = vrot.lane.b32.xlu2 %v540_v37, %s1414_s16  ;;  %v418_v45 = vrot.slane %v413_v41, 4  ;;  %v422_v48 = vsel %vm419_vm5, %v413_v41, %v421_v46 }
 0x23a   : > { %669 = vrot.lane.b32.xlu1 %v536_v36, %s1414_s16  ;;  %v430_v55 = vperm.slane %v422_v48, %v1566_v47  ;;  %s1273_s16 = scalar_lea.hbm %s1272_s12, 32 }
 0x23b   : > { %v420_v52 = vsel %vm419_vm5, %v418_v45, %v407_v34  ;;  %p1274_p1 = scmp.ne.s32.totalorder %s1272_s12, %s1273_s16  ;;  %p1279_p12 = scmp.lt.s32.totalorder %s1277_s9, %s1273_s16 }
 0x23c   : > { %v426_v57 = vperm.slane %v420_v52, %v1566_v47  ;;  %v457_v2 = vrot.slane %v430_v55, 4 }
 0x23d   : > { %p1275_p3 = pnand %p1274_p1, %p1528_p2  ;;  %p1280_p13 = por %p1279_p12, %p1278_p11 }
 0x23e   : > { %v445_v4 = vrot.slane %v426_v57, 4 }
 0x23f   : > { %p1276_p7 = pneg %p1275_p3 }
 0x241   : > { %p1281_p0 = pnand %p1280_p13, %p1276_p7 }
 0x28b   : > { %v544_v44 = vpop.permute.xlu2 %543 }
 0x28c   : > { %v567_v5 = vrot.slane %v544_v44, 4 }
 0x293   : > { %v1574_v62 = vpop.permute.xlu2 %673 }
 0x294   : > { %v691_v9 = vrot.slane %v1574_v62, 4 }
 0x29b   : > { %v546_v49 = vpop.permute.xlu0 %545  ;;  %v672_v50 = vpop.permute.xlu1 %671 }
 0x29c   : > { %v553_v53 = vrot.slane %v546_v49, 4  ;;  %v556_v56 = vsel %vm419_vm5, %v546_v49, %v555_v51  ;;  %v679_v59 = vrot.slane %v672_v50, 4  ;;  %v682_v0 = vsel %vm419_vm5, %v672_v50, %v681_v54 }
 0x29d   : > { %v564_v63 = vperm.slane %v556_v56, %v1566_v47  ;;  %v1584_v10 = vperm.slane %v682_v0, %v1566_v47 }
 0x29e   : > { %v554_v58 = vsel %vm419_vm5, %v553_v53, %v542_v38  ;;  %v680_v6 = vsel %vm419_vm5, %v679_v59, %v668_v39 }
 0x29f   : > { %v560_v3 = vperm.slane %v554_v58, %v1566_v47  ;;  %v591_v14 = vrot.slane %v564_v63, 4  ;;  %v1590_v19 = vperm.slane %v680_v6, %v1566_v47 }
 0x2a1   : > { %v579_v18 = vrot.slane %v560_v3, 4 }
 0x2a3   : > { %v416_v8 = vpop.permute.xlu0 %415 }
 0x2a4   : > { %v431_v11 = vrot.slane %v416_v8, 4  ;;  %v434_v12 = vsel %vm419_vm5, %v416_v8, %v433_v1  ;;  %v548_v13 = vpop.permute.xlu1 %547 }
 0x2a5   : > { %v442_v15 = vperm.slane %v434_v12, %v1566_v47  ;;  %v565_v16 = vrot.slane %v548_v13, 4  ;;  %v568_v17 = vsel %vm419_vm5, %v548_v13, %v567_v5 }
 0x2a6   : > { %v432_v20 = vsel %vm419_vm5, %v431_v11, %v410_v40  ;;  %v576_v21 = vperm.slane %v568_v17, %v1566_v47 }
 0x2a7   : > { %v438_v22 = vperm.slane %v432_v20, %v1566_v47  ;;  %v455_v23 = vrot.slane %v442_v15, 4  ;;  %v458_v24 = vsel %vm419_vm5, %v442_v15, %v457_v2  ;;  %v566_v25 = vsel %vm419_vm5, %v565_v16, %v544_v44 }
 0x2a8   : > { %v466_v26 = vperm.slane %v458_v24, %v1580_v7  ;;  %v572_v27 = vperm.slane %v566_v25, %v1566_v47  ;;  %v589_v28 = vrot.slane %v576_v21, 4  ;;  %v592_v29 = vsel %vm419_vm5, %v576_v21, %v591_v14 }
 0x2a9   : > { %v443_v30 = vrot.slane %v438_v22, 4  ;;  %v446_v31 = vsel %vm419_vm5, %v438_v22, %v445_v4  ;;  %v456_v32 = vsel %vm419_vm5, %v455_v23, %v430_v55  ;;  %v600_v33 = vperm.slane %v592_v29, %v1580_v7 }
 0x2aa   : > { %v454_v34 = vperm.slane %v446_v31, %v1580_v7  ;;  %v462_v35 = vperm.slane %v456_v32, %v1580_v7  ;;  %v473_v36 = vrot.slane %v466_v26, 4  ;;  %v577_v37 = vrot.slane %v572_v27, 4 }
 0x2ab   : > { %v444_v38 = vsel %vm419_vm5, %v443_v30, %v426_v57  ;;  %v580_v39 = vsel %vm419_vm5, %v572_v27, %v579_v18  ;;  %v590_v40 = vsel %vm419_vm5, %v589_v28, %v564_v63  ;;  %v607_v41 = vrot.slane %v600_v33, 4 }
 0x2ac   : > { %v450_v42 = vperm.slane %v444_v38, %v1580_v7  ;;  %v469_v43 = vrot.slane %v454_v34, 4  ;;  %v471_v44 = vrot.slane %v462_v35, 4  ;;  %v474_v45 = vsel %vm419_vm5, 0.0, %v473_v36  ;;  %v670_v32 = vpop.permute.xlu1 %669 }
 0x2ad   : > { %v486_v46 = vsel %vm419_vm5, %v473_v36, %v462_v35  ;;  %v491_v48 = vrot.slane %v474_v45, 4  ;;  %v578_v49 = vsel %vm419_vm5, %v577_v37, %v560_v3  ;;  %v588_v50 = vperm.slane %v580_v39, %v1580_v7 }
 0x2ae   : > { %v467_v51 = vrot.slane %v450_v42, 4  ;;  %v470_v52 = vsel %vm419_vm5, 0.0, %v469_v43  ;;  %v472_v53 = vsel %vm419_vm5, 0.0, %v471_v44  ;;  %v475_v54 = vsel %vm419_vm5, %v469_v43, %v450_v42 }
 0x2af   : > { %v479_v55 = vperm.slane %v475_v54, %v1566_v47  ;;  %v480_v56 = vrot.slane %v470_v52, 4  ;;  %v490_v57 = vperm.slane %v486_v46, %v1566_v47  ;;  %v492_v58 = vsel %vm419_vm5, %v491_v48, %v472_v53 }
 0x2b0   : > { %v468_v59 = vsel %vm419_vm5, 0.0, %v467_v51  ;;  %v496_v60 = vperm.slane %v492_v58, %v1566_v47  ;;  %v584_v61 = vperm.slane %v578_v49, %v1580_v7  ;;  %v596_v63 = vperm.slane %v590_v40, %v1580_v7 }
 0x2b1   : > { %v481_v0 = vsel %vm419_vm5, %v480_v56, %v468_v59  ;;  %v499_v1 = vrot.slane %v479_v55, 4  ;;  %v511_v2 = vrot.slane %v490_v57, 4  ;;  %v603_v3 = vrot.slane %v588_v50, 4 }
 0x2b2   : > { %v485_v4 = vperm.slane %v481_v0, %v1566_v47  ;;  %v509_v5 = vrot.slane %v496_v60, 4  ;;  %v601_v6 = vrot.slane %v584_v61, 4  ;;  %v605_v8 = vrot.slane %v596_v63, 4 }
 0x2b3   : > { %v512_v11 = vsel %vm419_vm5, %v496_v60, %v511_v2  ;;  %v604_v12 = vsel %vm419_vm5, 0.0, %v603_v3  ;;  %v608_v13 = vsel %vm419_vm5, 0.0, %v607_v41  ;;  %v609_v14 = vsel %vm419_vm5, %v603_v3, %v584_v61 }
 0x2b4   : > { %v497_v15 = vrot.slane %v485_v4, 4  ;;  %v500_v16 = vsel %vm419_vm5, %v485_v4, %v499_v1  ;;  %v510_v17 = vsel %vm419_vm5, %v509_v5, %v490_v57  ;;  %v520_v18 = vperm.slane %v512_v11, %v1580_v7 }
 0x2b5   : > { %v508_v20 = vperm.slane %v500_v16, %v1580_v7  ;;  %v516_v21 = vperm.slane %v510_v17, %v1580_v7  ;;  %v602_v22 = vsel %vm419_vm5, 0.0, %v601_v6  ;;  %v606_v23 = vsel %vm419_vm5, 0.0, %v605_v8 }
 0x2b6   : > { %v498_v24 = vsel %vm419_vm5, %v497_v15, %v479_v55  ;;  %v525_v25 = vrot.slane %v520_v18, 4  ;;  %v613_v26 = vperm.slane %v609_v14, %v1566_v47  ;;  %v614_v27 = vrot.slane %v604_v12, 4 }
 0x2b7   : > { %v504_v28 = vperm.slane %v498_v24, %v1580_v7  ;;  %v521_v29 = vrot.slane %v516_v21, 4  ;;  %v527_v30 = vrot.slane %v508_v20, 4  ;;  %v620_v31 = vsel %vm419_vm5, %v607_v41, %v596_v63 }
 0x2b8   : > { %v526_v33 = vsel %vm419_vm5, %v525_v25, %v508_v20  ;;  %v615_v34 = vsel %vm419_vm5, %v614_v27, %v602_v22  ;;  %v624_v35 = vperm.slane %v620_v31, %v1566_v47  ;;  %v625_v36 = vrot.slane %v608_v13, 4 }
 0x2b9   : > { %v522_v37 = vsel %vm419_vm5, %v521_v29, %v504_v28  ;;  %v523_v38 = vrot.slane %v504_v28, 4  ;;  %v528_v39 = vsel %vm419_vm5, %v520_v18, %v527_v30  ;;  %v619_v40 = vperm.slane %v615_v34, %v1566_v47  ;;  %532 = vst.msk [vmem:[%s1651_s13 + $0x10] sm:$0xff] %vm529_vm6, %v526_v33 }
 0x2ba   : > { %v626_v41 = vsel %vm419_vm5, %v625_v36, %v606_v23  ;;  %v633_v42 = vrot.slane %v613_v26, 4  ;;  %v645_v43 = vrot.slane %v624_v35, 4  ;;  %v692_v44 = vsel %vm419_vm5, %v691_v9, %v670_v32  ;;  %530 = vst.msk [vmem:[%s1651_s13] sm:$0xff] %vm529_vm6, %v522_v37 }
 0x2bb   : > { %v524_v45 = vsel %vm419_vm5, %v516_v21, %v523_v38  ;;  %v630_v46 = vperm.slane %v626_v41, %v1566_v47  ;;  %v631_v48 = vrot.slane %v619_v40, 4  ;;  %v693_v49 = vrot.slane %v670_v32, 4  ;;  %533 = vst.msk [vmem:[%s1651_s13 + $0x18] sm:$0xff] %vm529_vm6, %v528_v39 }
 0x2bc   : > { %v705_v50 = vrot.slane %v1590_v19, 4  ;;  %v717_v9 = vrot.slane %v1584_v10, 4  ;;  %v634_v51 = vsel %vm419_vm5, %v619_v40, %v633_v42  ;;  %v698_v52 = vperm.slane %v692_v44, %v1566_v47  ;;  %531 = vst.msk [vmem:[%s1651_s13 + $0x8] sm:$0xff] %vm529_vm6, %v524_v45 }
 0x2bd   : > { %v632_v53 = vsel %vm419_vm5, %v631_v48, %v613_v26  ;;  %v642_v54 = vperm.slane %v634_v51, %v1580_v7  ;;  %v643_v55 = vrot.slane %v630_v46, 4  ;;  %v646_v56 = vsel %vm419_vm5, %v630_v46, %v645_v43 }
 0x2be   : > { %1284 = shalt.err (!%p1281_p0)
}
 0x2bf   : > { %s1417_s7 = smov 128   ;;  %s1418_s29 = smov 8   ;;  %v638_v57 = vperm.slane %v632_v53, %v1580_v7  ;;  %v654_v58 = vperm.slane %v646_v56, %v1580_v7  ;;  %v694_v59 = vsel %vm419_vm5, %v1574_v62, %v693_v49  ;;  %v703_v60 = vrot.slane %v698_v52, 4 }
 0x2c0   : > { %1066 = dma.vmem_to_hbm [thread:$0]  (%p1528_p2), %s1670_s15, 512, %s820_s1, %s794_s11, %s1417_s7, %s1417_s7, %s1418_s29   ;;  %v644_v61 = vsel %vm419_vm5, %v643_v55, %v624_v35  ;;  %v661_v63 = vrot.slane %v642_v54, 4  ;;  %v702_v0 = vperm.slane %v694_v59, %v1566_v47  ;;  %v706_v1 = vsel %vm419_vm5, %v698_v52, %v705_v50 }
 0x2c1   : > { %s798_s12 = sand.u32 1, %s1485_s27   ;;  %v650_v2 = vperm.slane %v644_v61, %v1580_v7  ;;  %v657_v3 = vrot.slane %v638_v57, 4  ;;  %v659_v4 = vrot.slane %v654_v58, 4  ;;  %v704_v5 = vsel %vm419_vm5, %v703_v60, %v1590_v19  ;;  %s331_s15 = scalar_lea.vmem [#allocation9], %s1633_s18 }
 0x2c2   : > { %s835_s1 = sshll.u32 %s331_s15, 4  ;;  %s1726_s24 = sshll.u32 %s834_s10, 4  ;;  %v662_v62 = vsel %vm419_vm5, %v654_v58, %v661_v63  ;;  %v710_v6 = vperm.slane %v704_v5, %v1580_v7  ;;  %v714_v8 = vperm.slane %v706_v1, %v1580_v7  ;;  %v715_v11 = vrot.slane %v702_v0, 4  ;;  %s1739_s1 = int_to_ptr.vmem [resolvable:$true] %s835_s1  ;;  %s838_s24 = int_to_ptr.hbm [resolvable:$true] %s1726_s24 }
 0x2c3   : > { %v655_v12 = vrot.slane %v650_v2, 4  ;;  %v658_v13 = vsel %vm419_vm5, %v650_v2, %v657_v3  ;;  %v660_v19 = vsel %vm419_vm5, %v659_v4, %v642_v54  ;;  %v718_v14 = vsel %vm419_vm5, %v702_v0, %v717_v9  ;;  %666 = vst.msk [vmem:[%s331_s15 + $0x18] sm:$0xff] %vm529_vm6, %v662_v62  ;;  %s1752_s10 = scalar_lea.sflag [#allocation10], %s798_s12  ;;  %s1299_s19 = sshra.s32 %s838_s24, 4  ;;  %s1300_s19 = int_to_ptr.hbm [resolvable:$true] %s1299_s19 }
 0x2c4   : > { %v716_v15 = vsel %vm419_vm5, %v715_v11, %v1584_v10  ;;  %v726_v16 = vperm.slane %v718_v14, %v1580_v7  ;;  %v727_v17 = vrot.slane %v710_v6, 4  ;;  %v729_v18 = vrot.slane %v714_v8, 4  ;;  %664 = vst.msk [vmem:[%s331_s15 + $0x8] sm:$0xff] %vm529_vm6, %v658_v13  ;;  %s1301_s9 = scalar_lea.hbm %s1300_s19, 32  ;;  %s1305_s11 = scalar_lea.hbm %s1849_s5, 64 }
 0x2c5   : > { %v656_v20 = vsel %vm419_vm5, %v655_v12, %v638_v57  ;;  %v722_v21 = vperm.slane %v716_v15, %v1580_v7  ;;  %665 = vst.msk [vmem:[%s331_s15 + $0x10] sm:$0xff] %vm529_vm6, %v660_v19  ;;  %p1302_p4 = scmp.ne.s32.totalorder %s1300_s19, %s1301_s9  ;;  %p1306_p10 = scmp.lt.s32.totalorder %s1300_s19, %s1849_s5 }
 0x2c6   : > { %v728_v10 = vsel %vm419_vm5, 0.0, %v727_v17  ;;  %v730_v22 = vsel %vm419_vm5, 0.0, %v729_v18  ;;  %v733_v23 = vrot.slane %v726_v16, 4  ;;  %v735_v24 = vsel %vm419_vm5, %v729_v18, %v710_v6  ;;  %663 = vst.msk [vmem:[%s331_s15] sm:$0xff] %vm529_vm6, %v656_v20  ;;  %p1307_p1 = scmp.lt.s32.totalorder %s1305_s11, %s1301_s9 }
 0x2c7   : > { %v731_v25 = vrot.slane %v722_v21, 4  ;;  %v739_v26 = vperm.slane %v735_v24, %v1566_v47  ;;  %v740_v27 = vrot.slane %v730_v22, 4  ;;  %p1303_p6 = pnand %p1302_p4, %p1528_p2 }
 0x2c8   : > { %p1308_p3 = por %p1307_p1, %p1306_p10 }
 0x2c9   : > { %p1304_p9 = pneg %p1303_p6 }
 0x2cb   : > { %p1309_p7 = pnand %p1308_p3, %p1304_p9 }
 0x2cd   : > { %1312 = shalt.err (!%p1309_p7)
}
 0x2ce   : > { %1067 = dma.vmem_to_hbm [thread:$0]  (%p1528_p2), %s1739_s1, 512, %s838_s24, %s1752_s10, %s1417_s7, %s1417_s7, %s1418_s29   ;;  %v734_v28 = vsel %vm419_vm5, 0.0, %v733_v23  ;;  %v746_v29 = vsel %vm419_vm5, %v733_v23, %v722_v21  ;;  %v732_v30 = vsel %vm419_vm5, 0.0, %v731_v25  ;;  %v741_v31 = vsel %vm419_vm5, %v740_v27, %v728_v10 }
 0x2cf   : > { %v750_v32 = vperm.slane %v746_v29, %v1566_v47  ;;  %v751_v33 = vrot.slane %v734_v28, 4  ;;  %v745_v34 = vperm.slane %v741_v31, %v1566_v47  ;;  %v759_v35 = vrot.slane %v739_v26, 4  ;;  %s852_s1 = scalar_lea.hbm %s1850_s6, %s1625_s17  ;;  %s338_s19 = scalar_lea.vmem [#allocation11], %s1633_s18 }
 0x2d0   : > { %s1794_s24 = sshll.u32 %s852_s1, 4  ;;  %s853_s9 = sshll.u32 %s338_s19, 4  ;;  %s854_s9 = int_to_ptr.vmem [resolvable:$true] %s853_s9  ;;  %s856_s24 = int_to_ptr.hbm [resolvable:$true] %s1794_s24 }
 0x2d1   : > { %v752_v36 = vsel %vm419_vm5, %v751_v33, %v732_v30  ;;  %v771_v37 = vrot.slane %v750_v32, 4  ;;  %v757_v39 = vrot.slane %v745_v34, 4  ;;  %v760_v40 = vsel %vm419_vm5, %v745_v34, %v759_v35  ;;  %s1327_s17 = sshra.s32 %s856_s24, 4  ;;  %s1333_s11 = scalar_lea.hbm %s1850_s6, 64  ;;  %s1328_s17 = int_to_ptr.hbm [resolvable:$true] %s1327_s17 }
 0x2d2   : > { %v756_v38 = vperm.slane %v752_v36, %v1566_v47  ;;  %v768_v41 = vperm.slane %v760_v40, %v1580_v7  ;;  %s1329_s18 = scalar_lea.hbm %s1328_s17, 32  ;;  %p1334_p0 = scmp.lt.s32.totalorder %s1328_s17, %s1850_s6 }
 0x2d3   : > { %v758_v42 = vsel %vm419_vm5, %v757_v39, %v739_v26  ;;  %p1330_p11 = scmp.ne.s32.totalorder %s1328_s17, %s1329_s18  ;;  %p1335_p4 = scmp.lt.s32.totalorder %s1333_s11, %s1329_s18 }
 0x2d4   : > { %v769_v43 = vrot.slane %v756_v38, 4  ;;  %v772_v44 = vsel %vm419_vm5, %v756_v38, %v771_v37  ;;  %v764_v45 = vperm.slane %v758_v42, %v1580_v7  ;;  %v787_v47 = vrot.slane %v768_v41, 4 }
 0x2d5   : > { %v780_v46 = vperm.slane %v772_v44, %v1580_v7  ;;  %p1331_p12 = pnand %p1330_p11, %p1528_p2  ;;  %p1336_p6 = por %p1335_p4, %p1334_p0 }
 0x2d6   : > { %v770_v48 = vsel %vm419_vm5, %v769_v43, %v750_v32  ;;  %v783_v50 = vrot.slane %v764_v45, 4 }
 0x2d7   : > { %v776_v49 = vperm.slane %v770_v48, %v1580_v7  ;;  %v785_v9 = vrot.slane %v780_v46, 4  ;;  %v788_v51 = vsel %vm419_vm5, %v780_v46, %v787_v47  ;;  %p1332_p13 = pneg %p1331_p12 }
 0x2d8   : > { %792 = vst.msk [vmem:[%s338_s19 + $0x18] sm:$0xff] %vm529_vm6, %v788_v51 }
 0x2d9   : > { %v781_v52 = vrot.slane %v776_v49, 4  ;;  %v784_v53 = vsel %vm419_vm5, %v776_v49, %v783_v50  ;;  %v786_v54 = vsel %vm419_vm5, %v785_v9, %v768_v41  ;;  %p1337_p9 = pnand %p1336_p6, %p1332_p13 }
 0x2da   : > { %790 = vst.msk [vmem:[%s338_s19 + $0x8] sm:$0xff] %vm529_vm6, %v784_v53 }
 0x2db   : > { %v782_v7 = vsel %vm419_vm5, %v781_v52, %v764_v45  ;;  %791 = vst.msk [vmem:[%s338_s19 + $0x10] sm:$0xff] %vm529_vm6, %v786_v54 }
 0x2dc   : > { %789 = vst.msk [vmem:[%s338_s19] sm:$0xff] %vm529_vm6, %v782_v7 }
 0x2dd   : > { %1340 = shalt.err (!%p1337_p9)
}
 0x2de   : > { %1068 = dma.vmem_to_hbm [thread:$0]  (%p1528_p2), %s854_s9, 512, %s856_s24, %s1752_s10, %s1417_s7, %s1417_s7, %s1418_s29  }
 0x2df PF: > { %s870_s27 = sand.u32 1, %s1383_s21   ;;  %p1084_p10 = pnand %p1031_p8, %p1500_p5 }
 0x2e0   : > { %s871_s12 = scalar_lea.sflag [#allocation4], %s870_s27 }
 0x2e1   : > { %p1085_p1 = pneg %p1084_p10 }
 0x2e3   : > { %1374 = dma.done.wait (%p1085_p1), %s871_s12, 512  }
 0x2e4   : > { %1376 = vsyncadd (%p1085_p1), %s871_s12, 4294966784  ;;  %s1858_s1 = sadd.s32 4294967294, %s1403_s26  }
 0x2e5   : > { %s880_s8 = sand.u32 1, %s1858_s1  }
 0x2e6   : > { %s881_s19 = scalar_lea.sflag [#allocation10], %s880_s8 }
 0x2e7   : > { %1378 = dma.done.wait (%p1085_p1), %s881_s19, 1024  }
 0x2e8   : > { %1380 = vsyncadd (%p1085_p1), %s881_s19, 4294966272  ;;  %s27_s26 = sadd.s32 1, %s1403_s26   ;;  %s1859_s21 = smov %s1387_s22 }
 0x2e9   : > { %p24_p2 = scmp.ge.s32.totalorder %s27_s26, 4   ;;  %s1860_s22 = smov %s1391_s23 }
 0x2ea   : > { %s1861_s23 = smov %s1538_s14  ;;  %s1862_s24 = smov %s1399_s25 }
 0x2eb   : > { %s1863_s25 = smov %s1865_s20  ;;  %26 = sbr.rel (!%p24_p2) target bundleno = 11 (0xb), region = 121 }
 0x2f0   :  { %897 = vsyncpa [#allocation3], 1 }
 0x2f1   :  { %899 = vsyncpa [#allocation3 + $0x1], 1 }
 0x2f2   :  { %900 = vsyncpa [#allocation6], 1 }
 0x2f3   :  { %901 = vsyncpa [#allocation4], 1 }
 0x2f4   :  { %903 = vsyncpa [#allocation4 + $0x1], 1 }
 0x2f5   :  { %904 = vsyncpa [#allocation10], 1 }
 0x2f6   :  { %906 = vsyncpa [#allocation10 + $0x1], 1 }

</bundles_post_ra>
